<compile_context>
chip_gen: v7x
topology: tpu7x:2x2x1
jax: 0.10.0
libtpu: 0.0.40
codegen_flags: <defaults>
</compile_context>

<pallas_src>
import functools

import jax
import jax.numpy as jnp
from jax import lax
from jax.experimental import pallas as pl
from jax.experimental.pallas import tpu as pltpu

EPS = 1e-8            # torch.nn.functional.cosine_similarity default eps
_EPS_SQ = EPS * EPS


def _round_up(x, m):
    return ((x + m - 1) // m) * m


def _tcm_train_kernel(x_ref, embt_ref, cosmax_ref, counts_ref, *,
                      num_leafs, c_pad, l_pad, batch, block_rows):
    """Training tile: per-category cosine max + leaf-argmax bincount accumulation.

    x_ref      : (TB, D)        bf16   batch tile
    embt_ref   : (D, CL_pad)    bf16   pre-normalized, leaf-major, zero padded
    cosmax_ref : (TB, C_pad)    f32
    counts_ref : (L_pad, C_pad) f32    revisited accumulator (counts_T[l, c])
    """
    i = pl.program_id(0)

    x = x_ref[...]                                                    # bf16
    # Raw dot products on the MXU with f32 accumulation.
    cos = jnp.dot(x, embt_ref[...], preferred_element_type=jnp.float32)  # (TB, CL_pad)

    # Per-row inverse norm (EUP rsqrt); applied AFTER the leaf reduction.
    xf = x.astype(jnp.float32)
    x_inv = lax.rsqrt(jnp.maximum(jnp.sum(xf * xf, axis=-1, keepdims=True),
                                  jnp.float32(_EPS_SQ)))              # (TB, 1)

    # Running max / first-argmax over the L leaf groups.
    # Group l occupies lanes [l*C_pad, (l+1)*C_pad); strict '>' keeps the first
    # maximal leaf index, matching torch.max tie-breaking.
    best_val = cos[:, 0:c_pad]
    best_idx = jnp.zeros_like(best_val)
    for l in range(1, num_leafs):
        g = cos[:, l * c_pad:(l + 1) * c_pad]
        gt = g > best_val
        best_val = jnp.maximum(best_val, g)
        best_idx = jnp.where(gt, jnp.float32(l), best_idx)

    # Scale once on the reduced (TB, C_pad) tile (argmax is scale-invariant).
    cosmax_ref[...] = best_val * x_inv

    # Exclude batch-padding rows from the counts.
    if batch % block_rows != 0:
        row = i * block_rows + lax.broadcasted_iota(jnp.int32, best_idx.shape, 0)
        best_idx = jnp.where(row < batch, best_idx, jnp.float32(num_leafs))

    rows = [jnp.sum((best_idx == jnp.float32(l)).astype(jnp.float32),
                    axis=0, keepdims=True) for l in range(num_leafs)]
    if l_pad > num_leafs:
        rows.append(jnp.zeros((l_pad - num_leafs, c_pad), jnp.float32))
    inc = jnp.concatenate(rows, axis=0)                               # (L_pad, C_pad)

    @pl.when(i == 0)
    def _():
        counts_ref[...] = jnp.zeros_like(counts_ref)

    counts_ref[...] += inc


def _tcm_eval_kernel(x_ref, embt_ref, bias_ref, cosmax_ref, *, num_leafs, c_pad):
    """Eval tile: masked per-category cosine max only (no counts work)."""
    x = x_ref[...]
    cos = jnp.dot(x, embt_ref[...], preferred_element_type=jnp.float32)
    cos = cos + bias_ref[...]              # additive -inf mask (invalid / padded leaves)

    xf = x.astype(jnp.float32)
    x_inv = lax.rsqrt(jnp.maximum(jnp.sum(xf * xf, axis=-1, keepdims=True),
                                  jnp.float32(_EPS_SQ)))

    best = cos[:, 0:c_pad]
    for l in range(1, num_leafs):
        best = jnp.maximum(best, cos[:, l * c_pad:(l + 1) * c_pad])
    cosmax_ref[...] = best * x_inv


def _prep_embeddings(category_embeddings, c_pad, cl_pad):
    """Normalize leaves, pack leaf-major (col = l*C_pad + c), pad, transpose, bf16."""
    C, L, D = category_embeddings.shape
    emb = category_embeddings.astype(jnp.float32)
    norm = jnp.sqrt(jnp.sum(emb * emb, axis=-1, keepdims=True))
    en = emb / jnp.maximum(norm, EPS)                       # (C, L, D) unit rows
    en = jnp.transpose(en, (1, 0, 2))                       # (L, C, D) leaf-major
    en = jnp.pad(en, ((0, 0), (0, c_pad - C), (0, 0)))      # pad categories (zeros)
    en = en.reshape(L * c_pad, D)
    en = jnp.pad(en, ((0, cl_pad - L * c_pad), (0, 0)))
    return jnp.transpose(en).astype(jnp.bfloat16)           # (D, CL_pad)


def _prep_eval_bias(leaf_usage_counts, min_samples_leaf, c_pad, cl_pad):
    """Additive bias: 0 for valid leaves, -inf for invalid / padded columns."""
    C, L = leaf_usage_counts.shape
    valid = leaf_usage_counts >= min_samples_leaf                     # (C, L)
    bias = jnp.where(valid, 0.0, -jnp.inf).astype(jnp.float32).T      # (L, C)
    bias = jnp.pad(bias, ((0, 0), (0, c_pad - C)), constant_values=-jnp.inf)
    bias = bias.reshape(1, L * c_pad)
    bias = jnp.pad(bias, ((0, 0), (0, cl_pad - L * c_pad)), constant_values=-jnp.inf)
    return bias                                                        # (1, CL_pad)


def text_classification_forward(x, category_embeddings, leaf_usage_counts, *,
                                is_training=True, min_samples_leaf=10,
                                block_rows=512):
    """Functional equivalent of TextClassificationModel.forward.

    Returns (cosine_sim_max (B, C), new_leaf_usage_counts (C, L)).
    """
    C, L, D = category_embeddings.shape
    B = x.shape[0]

    c_pad = _round_up(C, 8)
    l_pad = _round_up(L, 8)
    cl_pad = _round_up(L * c_pad, 128)

    tb = min(block_rows, _round_up(B, 8))
    b_pad = _round_up(B, tb)

    emb_t = _prep_embeddings(category_embeddings, c_pad, cl_pad)   # (D, CL_pad) bf16

    xb = x.astype(jnp.bfloat16)        # halves x DMA bytes; MXU takes the bf16 path
    if b_pad != B:
        xb = jnp.pad(xb, ((0, b_pad - B), (0, 0)))

    grid = (b_pad // tb,)
    x_spec = pl.BlockSpec((tb, D), lambda i: (i, 0))
    emb_spec = pl.BlockSpec((D, cl_pad), lambda i: (0, 0))
    cos_spec = pl.BlockSpec((tb, c_pad), lambda i: (i, 0))

    if is_training:
        kernel = functools.partial(_tcm_train_kernel, num_leafs=L, c_pad=c_pad,
                                   l_pad=l_pad, batch=B, block_rows=tb)
        cos_pad, counts_t = pl.pallas_call(
            kernel,
            out_shape=(jax.ShapeDtypeStruct((b_pad, c_pad), jnp.float32),
                       jax.ShapeDtypeStruct((l_pad, c_pad), jnp.float32)),
            grid=grid,
            in_specs=[x_spec, emb_spec],
            out_specs=(cos_spec,
                       pl.BlockSpec((l_pad, c_pad), lambda i: (0, 0))),
            compiler_params=pltpu.CompilerParams(
                dimension_semantics=("arbitrary",)),   # counts block is revisited
        )(xb, emb_t)
        cosine_sim_max = cos_pad[:B, :C]
        new_counts = leaf_usage_counts + counts_t[:L, :C].T   # no_grad buffer update
        return cosine_sim_max, new_counts

    bias = _prep_eval_bias(leaf_usage_counts, min_samples_leaf, c_pad, cl_pad)
    kernel = functools.partial(_tcm_eval_kernel, num_leafs=L, c_pad=c_pad)
    cos_pad = pl.pallas_call(
        kernel,
        out_shape=jax.ShapeDtypeStruct((b_pad, c_pad), jnp.float32),
        grid=grid,
        in_specs=[x_spec, emb_spec, pl.BlockSpec((1, cl_pad), lambda i: (0, 0))],
        out_specs=cos_spec,
        compiler_params=pltpu.CompilerParams(
            dimension_semantics=("parallel",)),
    )(xb, emb_t, bias)
    return cos_pad[:B, :C], leaf_usage_counts


def _reference_forward(x, cat_emb, leaf_counts, is_training, min_samples_leaf):
    """Pure-JAX f32 mirror of the PyTorch forward (for sanity checking)."""
    x = x.astype(jnp.float32)
    cat_emb = cat_emb.astype(jnp.float32)
    dot = jnp.einsum('bd,cld->bcl', x, cat_emb)
    xn = jnp.maximum(jnp.linalg.norm(x, axis=-1), EPS)[:, None, None]
    cn = jnp.maximum(jnp.linalg.norm(cat_emb, axis=-1), EPS)[None, :, :]
    cos = dot / (xn * cn)
    if not is_training:
        valid = leaf_counts >= min_samples_leaf
        cos = jnp.where(valid[None, :, :], cos, -jnp.inf)
    return jnp.max(cos, axis=2)


if __name__ == "__main__":
    # Module defaults: num_categories=5, num_leafs_per_category=5, embedding_dim=128.
    B, C, L, D = 250, 5, 5, 128          # B=250 exercises batch padding/masking
    key = jax.random.PRNGKey(0)
    k_x, k_e = jax.random.split(key)

    x = jax.random.normal(k_x, (B, D), dtype=jnp.float32)
    category_embeddings = jax.random.normal(k_e, (C, L, D), dtype=jnp.float32)
    leaf_usage_counts = jnp.zeros((C, L), dtype=jnp.float32)

    # Training-mode forward (updates leaf usage counts buffer), 2 grid steps.
    cos_max_train, leaf_usage_counts = text_classification_forward(
        x, category_embeddings, leaf_usage_counts,
        is_training=True, block_rows=128)
    jax.block_until_ready((cos_max_train, leaf_usage_counts))

    # Eval-mode forward (masks leaves with too few samples).
    cos_max_eval, _ = text_classification_forward(
        x, category_embeddings, leaf_usage_counts,
        is_training=False, min_samples_leaf=48, block_rows=128)
    jax.block_until_ready(cos_max_eval)

    # Sanity checks against the pure-JAX f32 reference (kernel uses bf16 MXU operands
    # with f32 accumulation -> loose tolerance).
    ref_train = _reference_forward(x, category_embeddings, jnp.zeros((C, L)), True, 10)
    ref_eval = _reference_forward(x, category_embeddings, leaf_usage_counts, False, 48)
    assert cos_max_train.shape == (B, C) and cos_max_eval.shape == (B, C)
    assert jnp.allclose(cos_max_train, ref_train, atol=2e-2), "train mode mismatch"
    assert jnp.allclose(cos_max_eval, ref_eval, atol=2e-2), "eval mode mismatch"

    # Leaf usage counts: every (sample, category) contributes exactly one leaf.
    assert leaf_usage_counts.shape == (C, L)
    assert float(jnp.sum(leaf_usage_counts)) == float(B * C), "total count mismatch"
    assert bool(jnp.all(jnp.sum(leaf_usage_counts, axis=1) == B)), "per-category count mismatch"

    print("KERNEL_OK")
</pallas_src>

<mosaic_0001>
module attributes {stable_mosaic.version = 11 : i64} {
  func.func @_tcm_train_kernel(%arg0: i32, %arg1: memref<128x128xbf16, #tpu.memory_space<vmem>>, %arg2: memref<128x128xbf16, #tpu.memory_space<vmem>>, %arg3: memref<128x8xf32, #tpu.memory_space<vmem>>, %arg4: memref<8x8xf32, #tpu.memory_space<vmem>>) attributes {dimension_semantics = [#tpu.dimension_semantics<arbitrary>], iteration_bounds = array<i64: 2>, scalar_prefetch = 0 : i64, scratch_operands = 0 : i64, tpu.core_type = #tpu.core_type<tc>, window_params = [{transform_indices = @transform_0, window_bounds = array<i64: 128, 128>}, {pipeline_mode = #tpu.pipeline_mode<synchronous>, transform_indices = @transform_1, window_bounds = array<i64: 128, 128>}, {transform_indices = @transform_2, window_bounds = array<i64: 128, 8>}, {pipeline_mode = #tpu.pipeline_mode<synchronous>, transform_indices = @transform_3, window_bounds = array<i64: 8, 8>}]} {
    %c0 = arith.constant 0 : index
    %c0_0 = arith.constant 0 : index
    %0 = vector.load %arg1[%c0, %c0_0] : memref<128x128xbf16, #tpu.memory_space<vmem>>, vector<128x128xbf16>
    %c0_1 = arith.constant 0 : index
    %c0_2 = arith.constant 0 : index
    %1 = vector.load %arg2[%c0_1, %c0_2] : memref<128x128xbf16, #tpu.memory_space<vmem>>, vector<128x128xbf16>
    %cst = arith.constant dense<0.000000e+00> : vector<128x128xf32>
    %2 = tpu.matmul %0, %1, %cst {dimension_numbers = #tpu.dot_dimension_numbers<[1], [0], [0], [1], [0, 0, 1, 1], [], []>} : vector<128x128xbf16>, vector<128x128xbf16>, vector<128x128xf32> -> vector<128x128xf32>
    %3 = arith.extf %0 : vector<128x128xbf16> to vector<128x128xf32>
    %4 = arith.mulf %3, %3 : vector<128x128xf32>
    %cst_3 = arith.constant dense<0.000000e+00> : vector<128xf32>
    %5 = vector.multi_reduction <add>, %4, %cst_3 [1] : vector<128x128xf32> to vector<128xf32>
    %6 = vector.shape_cast %5 : vector<128xf32> to vector<128x1xf32>
    %cst_4 = arith.constant 1.000000e-16 : f32
    %7 = vector.broadcast %cst_4 : f32 to vector<128x1xf32>
    %8 = arith.maximumf %6, %7 : vector<128x1xf32>
    %9 = math.rsqrt %8 : vector<128x1xf32>
    %10 = vector.extract_strided_slice %2 {offsets = [0, 0], sizes = [128, 8], strides = [1, 1]} : vector<128x128xf32> to vector<128x8xf32>
    %cst_5 = arith.constant 0.000000e+00 : f32
    %11 = vector.broadcast %cst_5 : f32 to vector<128x8xf32>
    %12 = vector.extract_strided_slice %2 {offsets = [0, 8], sizes = [128, 8], strides = [1, 1]} : vector<128x128xf32> to vector<128x8xf32>
    %13 = arith.cmpf ogt, %12, %10 : vector<128x8xf32>
    %14 = arith.maximumf %10, %12 : vector<128x8xf32>
    %cst_6 = arith.constant 1.000000e+00 : f32
    %15 = vector.broadcast %cst_6 : f32 to vector<128x8xf32>
    %16 = arith.select %13, %15, %11 : vector<128x8xi1>, vector<128x8xf32>
    %17 = vector.extract_strided_slice %2 {offsets = [0, 16], sizes = [128, 8], strides = [1, 1]} : vector<128x128xf32> to vector<128x8xf32>
    %18 = arith.cmpf ogt, %17, %14 : vector<128x8xf32>
    %19 = arith.maximumf %14, %17 : vector<128x8xf32>
    %cst_7 = arith.constant 2.000000e+00 : f32
    %20 = vector.broadcast %cst_7 : f32 to vector<128x8xf32>
    %21 = arith.select %18, %20, %16 : vector<128x8xi1>, vector<128x8xf32>
    %22 = vector.extract_strided_slice %2 {offsets = [0, 24], sizes = [128, 8], strides = [1, 1]} : vector<128x128xf32> to vector<128x8xf32>
    %23 = arith.cmpf ogt, %22, %19 : vector<128x8xf32>
    %24 = arith.maximumf %19, %22 : vector<128x8xf32>
    %cst_8 = arith.constant 3.000000e+00 : f32
    %25 = vector.broadcast %cst_8 : f32 to vector<128x8xf32>
    %26 = arith.select %23, %25, %21 : vector<128x8xi1>, vector<128x8xf32>
    %27 = vector.extract_strided_slice %2 {offsets = [0, 32], sizes = [128, 8], strides = [1, 1]} : vector<128x128xf32> to vector<128x8xf32>
    %28 = arith.cmpf ogt, %27, %24 : vector<128x8xf32>
    %29 = arith.maximumf %24, %27 : vector<128x8xf32>
    %cst_9 = arith.constant 4.000000e+00 : f32
    %30 = vector.broadcast %cst_9 : f32 to vector<128x8xf32>
    %31 = arith.select %28, %30, %26 : vector<128x8xi1>, vector<128x8xf32>
    %32 = vector.broadcast %9 : vector<128x1xf32> to vector<128x8xf32>
    %33 = arith.mulf %29, %32 : vector<128x8xf32>
    %c0_10 = arith.constant 0 : index
    %c0_11 = arith.constant 0 : index
    %34 = vector.load %arg3[%c0_10, %c0_11] : memref<128x8xf32, #tpu.memory_space<vmem>>, vector<128x8xf32>
    tpu.vector_store %arg3[%c0_10, %c0_11], %33 {strides = array<i32>} : memref<128x8xf32, #tpu.memory_space<vmem>>, vector<128x8xf32>,
    %c128_i32 = arith.constant 128 : i32
    %35 = arith.muli %arg0, %c128_i32 : i32
    %36 = tpu.iota {dimensions = array<i32: 0>} : vector<128x8xi32>
    %37 = vector.broadcast %35 : i32 to vector<128x8xi32>
    %38 = arith.addi %37, %36 : vector<128x8xi32>
    %c250_i32 = arith.constant 250 : i32
    %39 = vector.broadcast %c250_i32 : i32 to vector<128x8xi32>
    %40 = arith.cmpi slt, %38, %39 : vector<128x8xi32>
    %cst_12 = arith.constant 5.000000e+00 : f32
    %41 = vector.broadcast %cst_12 : f32 to vector<128x8xf32>
    %42 = arith.select %40, %31, %41 : vector<128x8xi1>, vector<128x8xf32>
    %cst_13 = arith.constant 0.000000e+00 : f32
    %43 = vector.broadcast %cst_13 : f32 to vector<128x8xf32>
    %44 = arith.cmpf oeq, %42, %43 : vector<128x8xf32>
    %45 = arith.extui %44 : vector<128x8xi1> to vector<128x8xi32>
    %46 = arith.sitofp %45 : vector<128x8xi32> to vector<128x8xf32>
    %cst_14 = arith.constant dense<0.000000e+00> : vector<8xf32>
    %47 = vector.multi_reduction <add>, %46, %cst_14 [0] : vector<128x8xf32> to vector<8xf32>
    %48 = vector.shape_cast %47 : vector<8xf32> to vector<1x8xf32>
    %cst_15 = arith.constant 1.000000e+00 : f32
    %49 = vector.broadcast %cst_15 : f32 to vector<128x8xf32>
    %50 = arith.cmpf oeq, %42, %49 : vector<128x8xf32>
    %51 = arith.extui %50 : vector<128x8xi1> to vector<128x8xi32>
    %52 = arith.sitofp %51 : vector<128x8xi32> to vector<128x8xf32>
    %cst_16 = arith.constant dense<0.000000e+00> : vector<8xf32>
    %53 = vector.multi_reduction <add>, %52, %cst_16 [0] : vector<128x8xf32> to vector<8xf32>
    %54 = vector.shape_cast %53 : vector<8xf32> to vector<1x8xf32>
    %cst_17 = arith.constant 2.000000e+00 : f32
    %55 = vector.broadcast %cst_17 : f32 to vector<128x8xf32>
    %56 = arith.cmpf oeq, %42, %55 : vector<128x8xf32>
    %57 = arith.extui %56 : vector<128x8xi1> to vector<128x8xi32>
    %58 = arith.sitofp %57 : vector<128x8xi32> to vector<128x8xf32>
    %cst_18 = arith.constant dense<0.000000e+00> : vector<8xf32>
    %59 = vector.multi_reduction <add>, %58, %cst_18 [0] : vector<128x8xf32> to vector<8xf32>
    %60 = vector.shape_cast %59 : vector<8xf32> to vector<1x8xf32>
    %cst_19 = arith.constant 3.000000e+00 : f32
    %61 = vector.broadcast %cst_19 : f32 to vector<128x8xf32>
    %62 = arith.cmpf oeq, %42, %61 : vector<128x8xf32>
    %63 = arith.extui %62 : vector<128x8xi1> to vector<128x8xi32>
    %64 = arith.sitofp %63 : vector<128x8xi32> to vector<128x8xf32>
    %cst_20 = arith.constant dense<0.000000e+00> : vector<8xf32>
    %65 = vector.multi_reduction <add>, %64, %cst_20 [0] : vector<128x8xf32> to vector<8xf32>
    %66 = vector.shape_cast %65 : vector<8xf32> to vector<1x8xf32>
    %cst_21 = arith.constant 4.000000e+00 : f32
    %67 = vector.broadcast %cst_21 : f32 to vector<128x8xf32>
    %68 = arith.cmpf oeq, %42, %67 : vector<128x8xf32>
    %69 = arith.extui %68 : vector<128x8xi1> to vector<128x8xi32>
    %70 = arith.sitofp %69 : vector<128x8xi32> to vector<128x8xf32>
    %cst_22 = arith.constant dense<0.000000e+00> : vector<8xf32>
    %71 = vector.multi_reduction <add>, %70, %cst_22 [0] : vector<128x8xf32> to vector<8xf32>
    %72 = vector.shape_cast %71 : vector<8xf32> to vector<1x8xf32>
    %cst_23 = arith.constant 0.000000e+00 : f32
    %73 = vector.broadcast %cst_23 : f32 to vector<3x8xf32>
    %74 = tpu.concatenate %48, %54, %60, %66, %72, %73 in 0 : vector<1x8xf32>, vector<1x8xf32>, vector<1x8xf32>, vector<1x8xf32>, vector<1x8xf32>, vector<3x8xf32> -> vector<8x8xf32>
    %c0_i32 = arith.constant 0 : i32
    %75 = arith.cmpi eq, %arg0, %c0_i32 : i32
    %76 = arith.extui %75 : i1 to i32
    %c0_i32_24 = arith.constant 0 : i32
    %77 = arith.cmpi ne, %76, %c0_i32_24 : i32
    scf.if %77 {
      %cst_29 = arith.constant 0.000000e+00 : f32
      %81 = vector.broadcast %cst_29 : f32 to vector<8x8xf32>
      %c0_30 = arith.constant 0 : index
      %c0_31 = arith.constant 0 : index
      %82 = vector.load %arg4[%c0_30, %c0_31] : memref<8x8xf32, #tpu.memory_space<vmem>>, vector<8x8xf32>
      tpu.vector_store %arg4[%c0_30, %c0_31], %81 {strides = array<i32>} : memref<8x8xf32, #tpu.memory_space<vmem>>, vector<8x8xf32>,
    } else {
    }
    %c0_25 = arith.constant 0 : index
    %c0_26 = arith.constant 0 : index
    %78 = vector.load %arg4[%c0_25, %c0_26] : memref<8x8xf32, #tpu.memory_space<vmem>>, vector<8x8xf32>
    %79 = arith.addf %78, %74 : vector<8x8xf32>
    %c0_27 = arith.constant 0 : index
    %c0_28 = arith.constant 0 : index
    %80 = vector.load %arg4[%c0_27, %c0_28] : memref<8x8xf32, #tpu.memory_space<vmem>>, vector<8x8xf32>
    tpu.vector_store %arg4[%c0_27, %c0_28], %79 {strides = array<i32>} : memref<8x8xf32, #tpu.memory_space<vmem>>, vector<8x8xf32>,
    return
  }
  func.func @transform_0(%arg0: i32) -> (i32, i32) {
    %c0_i32 = arith.constant 0 : i32
    %c0_i32_0 = arith.constant 0 : i32
    return %arg0, %c0_i32 : i32, i32
  }
  func.func @transform_1(%arg0: i32) -> (i32, i32) {
    %c0_i32 = arith.constant 0 : i32
    %c0_i32_0 = arith.constant 0 : i32
    %c0_i32_1 = arith.constant 0 : i32
    return %c0_i32, %c0_i32_0 : i32, i32
  }
  func.func @transform_2(%arg0: i32) -> (i32, i32) {
    %c0_i32 = arith.constant 0 : i32
    %c0_i32_0 = arith.constant 0 : i32
    return %arg0, %c0_i32 : i32, i32
  }
  func.func @transform_3(%arg0: i32) -> (i32, i32) {
    %c0_i32 = arith.constant 0 : i32
    %c0_i32_0 = arith.constant 0 : i32
    %c0_i32_1 = arith.constant 0 : i32
    return %c0_i32, %c0_i32_0 : i32, i32
  }
}

</mosaic_0001>

<bundles_post_ra>
// kernel: tpu_custom_call.1
= control target key start
LH: loop header
LB: loop body
LE: loop exit
PB: predicated region body
PF: predicated region fallthrough
CT: control target
= control target key end

     0   :  { %9 = vsyncpa [#allocation3], 0  ;;  %s4087_s0 = inlined_call_operand.hbm [shape: bf16[256,128], index: 0, kind: input, shape index: {}]   ;;  %s4088_s1 = inlined_call_operand.hbm [shape: bf16[128,128], index: 1, kind: input, shape index: {}]   ;;  %s4089_s2 = inlined_call_operand.vmem [shape: f32[256,8], index: 2, kind: output, shape index: {0}]   ;;  %s4090_s3 = inlined_call_operand.hbm [shape: f32[8,8], index: 3, kind: output, shape index: {1}]  }
   0x1   :  { %11 = vsyncpa [#allocation3 + $0x1], 0 }
   0x2   :  { %12 = vsyncpa [#allocation6], 0 }
   0x3   :  { %13 = vsyncpa [#allocation4], 0  ;;  %s2598_s12 = smov 0   ;;  %s2600_s13 = smov 0  }
   0x4   :  { %s2602_s14 = smov 0   ;;  %s2604_s15 = smov 0  }
   0x5 LB: > { %s2617_s16 = sadd.s32 4294967295, %s2561_s15   ;;  %p39_p0 = scmp.ne.s32.totalorder %s2553_s13, %s2549_s12  ;;  %s2561_s15 = sphi %s2604_s15, %s4212_s15   ;;  %s2557_s14 = sphi %s2602_s14, %s4211_s14   ;;  %s2553_s13 = sphi %s2600_s13, %s4210_s13   ;;  %s2549_s12 = sphi %s2598_s12, %s4209_s12  }
   0x6   : > { %p4091_p1 = scmp.eq.s32.totalorder %s2617_s16, 0  ;;  %p2012_p2 = scmp.ge.s32.totalorder %s2561_s15, 1 }
   0x7   : > { %p118_p3 = scmp.lt.s32.totalorder %s2561_s15, 3  ;;  %s2563_s19 = smov [#allocation5]  }
   0x8   : > { %p2626_p5 = por %p4091_p1, %p39_p0  ;;  %s130_s20 = sshll.u32 %s2563_s19, 4  ;;  %s131_s20 = int_to_ptr.vmem [resolvable:$true] %s130_s20 }
   0x9   : > { %p2630_p6 = pnand %p2012_p2, %p118_p3  ;;  %s2643_s22 = sadd.s32 1, %s2561_s15  }
   0xa   : > { %s4111_s17 = scalar_select %p2626_p5, 1, 0 }
   0xb   : > { %s4112_s18 = scalar_select %p2630_p6, 1, 0 }
   0xc   : > { %p2200_p7 = pneg %p2630_p6  ;;  %s26_s23 = sadd.s32 1, %s2557_s14 }
   0xd   : > { %s23_s24 = ssub.s32 %s2561_s15, %s2643_s22  ;;  %s2435_s27 = scalar_lea.hbm %s4088_s1, 1024 }
   0xe   : > { %p2638_p8 = pnand %p2200_p7, %p4091_p1  ;;  %p2436_p9 = scmp.ne.s32.totalorder %s4088_s1, %s2435_s27 }
   0xf   : > { %p2442_p13 = scmp.lt.u32.totalorder %s2435_s27, %s4088_s1 }
  0x10   : > { %p2437_p10 = pneg %p2638_p8 }
  0x12   : > { %p2438_p11 = pnand %p2437_p10, %p2436_p9 }
  0x14   : > { %p2439_p12 = pneg %p2438_p11 }
  0x16   : > { %p2444_p0 = pnand %p2442_p13, %p2439_p12 }
  0x18   : > { %2447 = shalt.err (!%p2444_p0)
}
  0x19   : > { %s2448_s5 = scalar_lea.vmem %s131_s20, 1024  ;;  %p2456_p4 = scmp.lt.s32.totalorder %s131_s20, %s131_s20 }
  0x1a   : > { %p2449_p2 = scmp.ne.s32.totalorder %s131_s20, %s2448_s5  ;;  %p2457_p1 = scmp.lt.s32.totalorder %s2448_s5, %s2448_s5 }
  0x1c   : > { %p2451_p3 = pnand %p2449_p2, %p2437_p10  ;;  %p2458_p5 = por %p2457_p1, %p2456_p4 }
  0x1e   : > { %p2452_p7 = pneg %p2451_p3 }
  0x20   : > { %p2459_p6 = pnand %p2458_p5, %p2452_p7 }
  0x22   : > { %2462 = shalt.err (!%p2459_p6)
}
  0x23   : > { %s2564_s6 = smov 64   ;;  %s2565_s7 = smov 4  }
  0x24   : > { %2203 = dma.hbm_to_vmem [thread:$0]  (!%p2638_p8), %s4088_s1, 1024, %s131_s20, [#allocation6], %s2564_s6, %s2564_s6, %s2565_s7  }
  0x25   : > { %p24_p1 = scmp.eq.s32.totalorder %s23_s24, 0  ;;  %p33_p4 = scmp.ne.s32.totalorder %s2557_s14, %s2553_s13 }
  0x26   : > { %p34_p5 = scmp.eq.s32.totalorder %s2561_s15, 0  ;;  %p2209_p6 = scmp.lt.s32.totalorder %s2561_s15, 2 }
  0x27   : > { %s2672_s10 = scalar_select %p24_p1, %s2557_s14, %s26_s23  }
  0x28   : > { %p35_p9 = por %p34_p5, %p33_p4  ;;  %s144_s11 = sand.u32 1, %s2557_s14  }
  0x29   : > { %s2015_s12 = sshll.u32 %s144_s11, 6  ;;  %s2125_s19 = sshll.u32 %s2561_s15, 10 }
  0x2a   : > { %s2679_s21 = scalar_lea.hbm %s4087_s0, %s2125_s19  ;;  %s148_s20 = scalar_lea.vmem [#allocation2], %s2015_s12 }
  0x2b   : > { %s155_s24 = sshll.u32 %s148_s20, 4  ;;  %p2683_p8 = pnand %p2209_p6, %p35_p9  ;;  %s2681_s24 = int_to_ptr.vmem [resolvable:$true] %s155_s24 }
  0x2c   : > { %s2687_s15 = scalar_lea.sflag [#allocation3], %s144_s11  ;;  %s2463_s27 = scalar_lea.hbm %s2679_s21, 1024 }
  0x2d   : > { %p2464_p10 = scmp.ne.s32.totalorder %s2679_s21, %s2463_s27  ;;  %p2465_p11 = pneg %p2683_p8 }
  0x2e   : > { %s2468_s30 = scalar_lea.hbm %s4087_s0, 2048  ;;  %p2469_p0 = scmp.lt.u32.totalorder %s2679_s21, %s4087_s0 }
  0x2f   : > { %p2466_p12 = pnand %p2465_p11, %p2464_p10  ;;  %p2470_p2 = scmp.lt.u32.totalorder %s2468_s30, %s2463_s27 }
  0x30   : > { %p2472_p7 = scmp.lt.u32.totalorder %s2463_s27, %s2679_s21 }
  0x31   : > { %p2467_p13 = pneg %p2466_p12  ;;  %p2471_p3 = por %p2470_p2, %p2469_p0 }
  0x33   : > { %p2473_p1 = por %p2472_p7, %p2471_p3 }
  0x35   : > { %p2474_p4 = pnand %p2473_p1, %p2467_p13 }
  0x37   : > { %2477 = shalt.err (!%p2474_p4)
}
  0x38   : > { %s2478_s8 = scalar_lea.vmem %s2681_s24, 1024  ;;  %s2566_s9 = smov [#allocation2]  }
  0x39   : > { %p2479_p5 = scmp.ne.s32.totalorder %s2681_s24, %s2478_s8  ;;  %s2483_s11 = sshll.u32 %s2566_s9, 4  ;;  %s2484_s11 = int_to_ptr.vmem [resolvable:$false] %s2483_s11 }
  0x3a   : > { %s2485_s12 = scalar_lea.vmem %s2484_s11, 2048  ;;  %p2486_p10 = scmp.lt.s32.totalorder %s2681_s24, %s2484_s11 }
  0x3b   : > { %p2481_p6 = pnand %p2479_p5, %p2465_p11  ;;  %p2487_p12 = scmp.lt.s32.totalorder %s2485_s12, %s2478_s8 }
  0x3d   : > { %p2482_p9 = pneg %p2481_p6  ;;  %p2488_p0 = por %p2487_p12, %p2486_p10 }
  0x3f   : > { %p2489_p2 = pnand %p2488_p0, %p2482_p9 }
  0x41   : > { %2492 = shalt.err (!%p2489_p2)
}
  0x42   : > { %2207 = dma.hbm_to_vmem [thread:$0]  (!%p2683_p8), %s2679_s21, 1024, %s2681_s24, %s2687_s15, %s2564_s6, %s2564_s6, %s2565_s7  }
  0x43   : > { %p4115_p11 = scmp.ne.s32.totalorder %s4112_s18, 0 }
  0x45   : > { %167 = sbr.rel (%p4115_p11) target bundleno = 1094 (0x446), region = 28 }
  0x4c   : > { %s169_s19 = sand.u32 1, %s2553_s13   ;;  %p4116_p13 = scmp.ne.s32.totalorder %s4111_s17, 0 }
  0x4d   : > { %s2019_s25 = sshll.u32 %s169_s19, 6  ;;  %s170_s26 = scalar_lea.sflag [#allocation3], %s169_s19 }
  0x4e   : > { %s2721_s20 = scalar_lea.vmem [#allocation2], %s2019_s25 }
  0x4f   : > { %2536 = dma.done.wait (%p4116_p13), %s170_s26, 1024  }
  0x50   : > { %2538 = vsyncadd (%p4116_p13), %s170_s26, 4294966272  ;;  %p4117_p3 = scmp.eq.s32.totalorder %s2617_s16, 0 }
  0x52   : > { %2540 = dma.done.wait (%p4117_p3), [#allocation6], 1024   ;;  %p4118_p8 = pmov %p4117_p3 }
  0x53   : > { %v2379_v0 = vld [vmem:[#allocation5] sm:$0xff]   ;;  %v2380_v1 = vld [vmem:[#allocation5 + $0x8] sm:$0xff]   ;;  %v2381_v2 = vld [vmem:[#allocation5 + $0x10] sm:$0xff]   ;;  %s2567_s17 = smov 8   ;;  %s2568_s18 = smov 120  }
  0x54   : > { %2542 = vsyncadd (%p4118_p8), [#allocation6], 4294966272  ;;  %2142 = vmatprep.subr.bf16.mxu0 %v2379_v0  ;;  %2174 = vmatprep.subr.bf16.mxu1 %v2379_v0  ;;  %v2382_v3 = vld [vmem:[#allocation5 + $0x18] sm:$0xff]   ;;  %v208_v4 = vld [vmem:[%s2721_s20] sm:$0xff]   ;;  %s2569_s6 = smov 112   ;;  %s2571_s7 = smov 16  }
  0x55   : > { %2143 = vmatpush3.bf16.msra.mxu0 %v2379_v0  ;;  %2182 = vmatpush3.bf16.msra.mxu1 %v2379_v0  ;;  %v216_v5 = vld [vmem:[%s2721_s20 + $0x20] sm:$0xff]   ;;  %v2734_v6 = vld [vmem:[%s2721_s20 + $0x8] sm:$0xff]   ;;  %v433_v8 = vunpack.c.l.bf16 %v208_v4  ;;  %v434_v13 = vunpack.c.h.bf16 %v208_v4  ;;  %v212_v14 = vld [vmem:[%s2721_s20 + $0x10] sm:$0xff]   ;;  %s2572_s21 = smov 24   ;;  %s2573_s24 = smov 104  }
  0x56   : > { %2144 = vmatprep.subr.bf16.mxu0 %v2380_v1  ;;  %2175 = vmatprep.subr.bf16.mxu1 %v2380_v1  ;;  %v435_v7 = vunpack.c.l.bf16 %v2734_v6  ;;  %v436_v10 = vunpack.c.h.bf16 %v2734_v6  ;;  %v2383_v11 = vld [vmem:[#allocation5 + $0x20] sm:$0xff]   ;;  %v438_v17 = vunpack.c.h.bf16 %v212_v14  ;;  %v437_v18 = vunpack.c.l.bf16 %v212_v14  ;;  %v2384_v19 = vld [vmem:[#allocation5 + $0x28] sm:$0xff]   ;;  %v214_v20 = vld [vmem:[%s2721_s20 + $0x18] sm:$0xff]   ;;  %s2574_s23 = smov 32   ;;  %s2575_s15 = smov 96  }
  0x57   : > { %v449_v12 = vmul.f32 %v433_v8, %v433_v8  ;;  %2158 = vmatprep.mubr.bf16.mxu0 %v208_v4  ;;  %2166 = vmatprep.mubr.bf16.mxu1 %v216_v5  ;;  %v450_v16 = vmul.f32 %v434_v13, %v434_v13  ;;  %v440_v23 = vunpack.c.h.bf16 %v214_v20  ;;  %v439_v24 = vunpack.c.l.bf16 %v214_v20  ;;  %v2385_v25 = vld [vmem:[#allocation5 + $0x30] sm:$0xff]   ;;  %v2386_v30 = vld [vmem:[#allocation5 + $0x38] sm:$0xff]   ;;  %v218_v33 = vld [vmem:[%s2721_s20 + $0x28] sm:$0xff]   ;;  %s2039_s27 = sshll.u32 %s2617_s16, 7  ;;  %s2021_s28 = sshll.u32 %s2617_s16, 4 }
  0x58   : > { %v451_v9 = vmul.f32 %v435_v7, %v435_v7  ;;  %v452_v15 = vmul.f32 %v436_v10, %v436_v10  ;;  %v454_v21 = vmul.f32 %v438_v17, %v438_v17  ;;  %v453_v22 = vmul.f32 %v437_v18, %v437_v18  ;;  %v220_v34 = vld [vmem:[%s2721_s20 + $0x30] sm:$0xff]   ;;  %v222_v41 = vld [vmem:[%s2721_s20 + $0x38] sm:$0xff]   ;;  %p3800_p7 = scmp.lt.s32.totalorder %s2021_s28, 31  ;;  %p4208_p1 = scmp.ne.s32.totalorder %s2617_s16, 0 }
  0x59   : > { %2145 = vmatpush3.bf16.msra.mxu0 %v2380_v1  ;;  %2183 = vmatpush3.bf16.msra.mxu1 %v2380_v1  ;;  %v456_v26 = vmul.f32 %v440_v23, %v440_v23  ;;  %v455_v27 = vmul.f32 %v439_v24, %v439_v24  ;;  %v442_v28 = vunpack.c.h.bf16 %v216_v5  ;;  %v441_v29 = vunpack.c.l.bf16 %v216_v5 }
  0x5a   : > { %2146 = vmatprep.subr.bf16.mxu0 %v2381_v2  ;;  %2176 = vmatprep.subr.bf16.mxu1 %v2381_v2  ;;  %v444_v35 = vunpack.c.h.bf16 %v218_v33  ;;  %v443_v36 = vunpack.c.l.bf16 %v218_v33  ;;  %v446_v39 = vunpack.c.h.bf16 %v220_v34  ;;  %v445_v40 = vunpack.c.l.bf16 %v220_v34  ;;  %s4214_s28 = smov (!%p3800_p7, %s2021_s28), 31 }
  0x5b   : > { %469 = vadd.xlane.f32.xlu1 %v451_v9  ;;  %465 = vadd.xlane.f32.xlu0 %v449_v12  ;;  %v458_v31 = vmul.f32 %v442_v28, %v442_v28  ;;  %v457_v32 = vmul.f32 %v441_v29, %v441_v29  ;;  %v448_v44 = vunpack.c.h.bf16 %v222_v41  ;;  %v447_v45 = vunpack.c.l.bf16 %v222_v41  ;;  %s2022_s30 = sshll.u32 %s4214_s28, 3 }
  0x5c   : > { %v460_v37 = vmul.f32 %v444_v35, %v444_v35  ;;  %v459_v38 = vmul.f32 %v443_v36, %v443_v36  ;;  %v462_v42 = vmul.f32 %v446_v39, %v446_v39  ;;  %v461_v43 = vmul.f32 %v445_v40, %v445_v40  ;;  %s3849_s8 = scalar_lea.vmem %s4089_s2, %s2022_s30 }
  0x5d   : > { %2147 = vmatpush3.bf16.msra.mxu0 %v2381_v2  ;;  %2184 = vmatpush3.bf16.msra.mxu1 %v2381_v2  ;;  %v464_v46 = vmul.f32 %v448_v44, %v448_v44  ;;  %v463_v47 = vmul.f32 %v447_v45, %v447_v45 }
  0x5e   : > { %2148 = vmatprep.subr.bf16.mxu0 %v2382_v3  ;;  %2177 = vmatprep.subr.bf16.mxu1 %v2382_v3 }
  0x5f   : > { %471 = vadd.xlane.f32.xlu1 %v452_v15  ;;  %467 = vadd.xlane.f32.xlu0 %v450_v16 }
  0x61   : > { %2149 = vmatpush3.bf16.msra.mxu0 %v2382_v3  ;;  %2185 = vmatpush3.bf16.msra.mxu1 %v2382_v3 }
  0x62   : > { %2150 = vmatprep.subr.bf16.mxu0 %v2383_v11  ;;  %2178 = vmatprep.subr.bf16.mxu1 %v2383_v11 }
  0x63   : > { %475 = vadd.xlane.f32.xlu1 %v454_v21  ;;  %473 = vadd.xlane.f32.xlu0 %v453_v22  ;;  %v4094_v21 = vmov 0.0  }
  0x65   : > { %2151 = vmatpush3.bf16.msra.mxu0 %v2383_v11  ;;  %2186 = vmatpush3.bf16.msra.mxu1 %v2383_v11 }
  0x66   : > { %2152 = vmatprep.subr.bf16.mxu0 %v2384_v19  ;;  %2179 = vmatprep.subr.bf16.mxu1 %v2384_v19 }
  0x67   : > { %479 = vadd.xlane.f32.xlu1 %v456_v26  ;;  %477 = vadd.xlane.f32.xlu0 %v455_v27 }
  0x69   : > { %2153 = vmatpush3.bf16.msra.mxu0 %v2384_v19  ;;  %2187 = vmatpush3.bf16.msra.mxu1 %v2384_v19 }
  0x6a   : > { %2154 = vmatprep.subr.bf16.mxu0 %v2385_v25  ;;  %2180 = vmatprep.subr.bf16.mxu1 %v2385_v25 }
  0x6b   : > { %483 = vadd.xlane.f32.xlu1 %v458_v31  ;;  %481 = vadd.xlane.f32.xlu0 %v457_v32 }
  0x6d   : > { %2155 = vmatpush3.bf16.msra.mxu0 %v2385_v25  ;;  %2188 = vmatpush3.bf16.msra.mxu1 %v2385_v25 }
  0x6e   : > { %2156 = vmatprep.subr.bf16.mxu0 %v2386_v30  ;;  %2181 = vmatprep.subr.bf16.mxu1 %v2386_v30 }
  0x6f   : > { %487 = vadd.xlane.f32.xlu1 %v460_v37  ;;  %485 = vadd.xlane.f32.xlu0 %v459_v38 }
  0x71   : > { %2157 = vmatpush3.bf16.msra.mxu0 %v2386_v30  ;;  %2189 = vmatpush3.bf16.msra.mxu1 %v2386_v30 }
  0x73   : > { %491 = vadd.xlane.f32.xlu1 %v462_v42  ;;  %489 = vadd.xlane.f32.xlu0 %v461_v43 }
  0x74   : > { %2159 = vmatmul.mubr.bf16.vlgmr.msra.gmra.mrb[0].mxu0 %v2734_v6  ;;  %2167 = vmatmul.mubr.bf16.vlgmr.msra.gmra.mrb[0].mxu1 %v218_v33 }
  0x75   : > { %2162 = vmatprep.mubr.bf16.mxu0 %v212_v14  ;;  %2170 = vmatprep.mubr.bf16.mxu1 %v220_v34 }
  0x77   : > { %495 = vadd.xlane.f32.xlu1 %v464_v46  ;;  %493 = vadd.xlane.f32.xlu0 %v463_v47 }
  0x7c   : > { %2163 = vmatmul.mubr.bf16.gmra.mrb[4].mxu0 %v214_v20  ;;  %2171 = vmatmul.mubr.bf16.gmra.mrb[4].mxu1 %v222_v41 }
  0xe8   : > { %v2844_v0 = vpop.xlane.xlu1 %469  ;;  %v2846_v1 = vpop.xlane.xlu0 %465 }
  0xec   : > { %v2856_v2 = vpop.xlane.xlu1 %471  ;;  %v2858_v3 = vpop.xlane.xlu0 %467 }
  0xf0   : > { %v2864_v4 = vpop.xlane.xlu1 %475  ;;  %v2866_v5 = vpop.xlane.xlu0 %473 }
  0xf4   : > { %v2876_v6 = vpop.xlane.xlu1 %479  ;;  %v2878_v7 = vpop.xlane.xlu0 %477 }
  0xf5   : > { %4119 = vst [vmem:[#allocation11_spill] sm:$0xff] %v2878_v7 }
  0xf8   : > { %v2884_v8 = vpop.xlane.xlu1 %483  ;;  %v2886_v9 = vpop.xlane.xlu0 %481 }
  0xf9   : > { %4120 = vst [vmem:[#allocation12_spill] sm:$0xff] %v2884_v8  ;;  %4121 = vst [vmem:[#allocation13_spill] sm:$0xff] %v2886_v9 }
  0xfc   : > { %v2892_v10 = vpop.xlane.xlu1 %487  ;;  %v2894_v11 = vpop.xlane.xlu0 %485 }
  0xfd   : > { %4122 = vst [vmem:[#allocation14_spill] sm:$0xff] %v2892_v10  ;;  %4123 = vst [vmem:[#allocation15_spill] sm:$0xff] %v2894_v11 }
 0x100   : > { %v2896_v12 = vpop.xlane.xlu1 %491  ;;  %v2898_v13 = vpop.xlane.xlu0 %489 }
 0x101   : > { %4124 = vst [vmem:[#allocation16_spill] sm:$0xff] %v2896_v12  ;;  %4125 = vst [vmem:[#allocation17_spill] sm:$0xff] %v2898_v13 }
 0x104   : > { %v2900_v14 = vpop.xlane.xlu1 %495  ;;  %v2902_v15 = vpop.xlane.xlu0 %493 }
 0x105   : > { %4126 = vst [vmem:[#allocation18_spill] sm:$0xff] %v2900_v14  ;;  %4127 = vst [vmem:[#allocation19_spill] sm:$0xff] %v2902_v15 }
 0x147   : > { %v2744_v48 = vpop.f32.mrb[0].mxu0  ;;  %v2746_v49 = vpop.f32.mrb[0].mxu1 }
 0x148   : > { %565 = vrot.lane.b32.xlu0 %v2746_v49, %s2567_s17  ;;  %549 = vrot.lane.b32.xlu1 %v2744_v48, %s2567_s17  ;;  %v2752_v50 = vpop.f32.mrb[1].mxu0  ;;  %v2754_v51 = vpop.f32.mrb[1].mxu1 }
 0x149   : > { %v2756_v52 = vpop.f32.mrb[2].mxu0  ;;  %v2758_v53 = vpop.f32.mrb[2].mxu1 }
 0x14a   : > { %v2760_v54 = vpop.f32.mrb[3].mxu0  ;;  %v2762_v55 = vpop.f32.mrb[3].mxu1 }
 0x14c   : > { %613 = vrot.lane.b32.xlu0 %v2744_v48, %s2568_s18  ;;  %551 = vrot.lane.b32.xlu1 %v2756_v52, %s2567_s17 }
 0x14f   : > { %v2768_v56 = vpop.f32.mrb[4].mxu0  ;;  %v2770_v57 = vpop.f32.mrb[4].mxu1 }
 0x150   : > { %629 = vrot.lane.b32.xlu0 %v2746_v49, %s2568_s18  ;;  %567 = vrot.lane.b32.xlu1 %v2758_v53, %s2567_s17  ;;  %v2776_v58 = vpop.f32.mrb[5].mxu0  ;;  %v2778_v59 = vpop.f32.mrb[5].mxu1 }
 0x151   : > { %v2780_v60 = vpop.f32.mrb[6].mxu0  ;;  %v2782_v61 = vpop.f32.mrb[6].mxu1 }
 0x152   : > { %v2784_v62 = vpop.f32.mrb[7].mxu0  ;;  %v2786_v63 = vpop.f32.mrb[7].mxu1 }
 0x154   : > { %773 = vrot.lane.b32.xlu0 %v2744_v48, %s2569_s6  ;;  %615 = vrot.lane.b32.xlu1 %v2756_v52, %s2568_s18 }
 0x158   : > { %789 = vrot.lane.b32.xlu0 %v2746_v49, %s2569_s6  ;;  %631 = vrot.lane.b32.xlu1 %v2758_v53, %s2568_s18 }
 0x15c   : > { %545 = vrot.lane.b32.xlu0 %v2752_v50, %s2567_s17  ;;  %775 = vrot.lane.b32.xlu1 %v2756_v52, %s2569_s6 }
 0x160   : > { %561 = vrot.lane.b32.xlu0 %v2754_v51, %s2567_s17  ;;  %791 = vrot.lane.b32.xlu1 %v2758_v53, %s2569_s6 }
 0x164   : > { %609 = vrot.lane.b32.xlu0 %v2752_v50, %s2568_s18  ;;  %547 = vrot.lane.b32.xlu1 %v2760_v54, %s2567_s17 }
 0x168   : > { %625 = vrot.lane.b32.xlu0 %v2754_v51, %s2568_s18  ;;  %563 = vrot.lane.b32.xlu1 %v2762_v55, %s2567_s17 }
 0x16c   : > { %769 = vrot.lane.b32.xlu0 %v2752_v50, %s2569_s6  ;;  %611 = vrot.lane.b32.xlu1 %v2760_v54, %s2568_s18 }
 0x170   : > { %785 = vrot.lane.b32.xlu0 %v2754_v51, %s2569_s6  ;;  %627 = vrot.lane.b32.xlu1 %v2762_v55, %s2568_s18 }
 0x174   : > { %771 = vrot.lane.b32.xlu1 %v2760_v54, %s2569_s6  ;;  %557 = vrot.lane.b32.xlu0 %v2768_v56, %s2567_s17 }
 0x178   : > { %787 = vrot.lane.b32.xlu1 %v2762_v55, %s2569_s6  ;;  %573 = vrot.lane.b32.xlu0 %v2770_v57, %s2567_s17 }
 0x17c   : > { %621 = vrot.lane.b32.xlu0 %v2768_v56, %s2568_s18  ;;  %559 = vrot.lane.b32.xlu1 %v2780_v60, %s2567_s17 }
 0x180   : > { %637 = vrot.lane.b32.xlu0 %v2770_v57, %s2568_s18  ;;  %575 = vrot.lane.b32.xlu1 %v2782_v61, %s2567_s17 }
 0x184   : > { %781 = vrot.lane.b32.xlu0 %v2768_v56, %s2569_s6  ;;  %623 = vrot.lane.b32.xlu1 %v2780_v60, %s2568_s18 }
 0x188   : > { %797 = vrot.lane.b32.xlu0 %v2770_v57, %s2569_s6  ;;  %639 = vrot.lane.b32.xlu1 %v2782_v61, %s2568_s18 }
 0x18c   : > { %553 = vrot.lane.b32.xlu0 %v2776_v58, %s2567_s17  ;;  %783 = vrot.lane.b32.xlu1 %v2780_v60, %s2569_s6 }
 0x190   : > { %569 = vrot.lane.b32.xlu0 %v2778_v59, %s2567_s17  ;;  %555 = vrot.lane.b32.xlu1 %v2784_v62, %s2567_s17 }
 0x194   : > { %617 = vrot.lane.b32.xlu0 %v2776_v58, %s2568_s18  ;;  %571 = vrot.lane.b32.xlu1 %v2786_v63, %s2567_s17 }
 0x198   : > { %633 = vrot.lane.b32.xlu0 %v2778_v59, %s2568_s18  ;;  %619 = vrot.lane.b32.xlu1 %v2784_v62, %s2568_s18 }
 0x19c   : > { %777 = vrot.lane.b32.xlu0 %v2776_v58, %s2569_s6  ;;  %635 = vrot.lane.b32.xlu1 %v2786_v63, %s2568_s18 }
 0x1a0   : > { %793 = vrot.lane.b32.xlu0 %v2778_v59, %s2569_s6  ;;  %779 = vrot.lane.b32.xlu1 %v2784_v62, %s2569_s6 }
 0x1a4   : > { %799 = vrot.lane.b32.xlu0 %v2782_v61, %s2569_s6  ;;  %795 = vrot.lane.b32.xlu1 %v2786_v63, %s2569_s6 }
 0x1ba   : > { %v566_v16 = vpop.permute.xlu0 %565  ;;  %v550_v17 = vpop.permute.xlu1 %549 }
 0x1bb   : > { %vm595_vm0 = vcmp.gt.f32.partialorder %v2744_v48, %v550_v17  ;;  %vm603_vm2 = vcmp.gt.f32.partialorder %v2746_v49, %v566_v16 }
 0x1bc   : > { %v675_v22 = vsel %vm595_vm0, 1.0, %v4094_v21  ;;  %v683_v28 = vsel %vm603_vm2, 1.0, %v4094_v21 }
 0x1be   : > { %v614_v18 = vpop.permute.xlu0 %613  ;;  %v552_v19 = vpop.permute.xlu1 %551 }
 0x1bf   : > { %v2906_v20 = vmax.f32 %v2744_v48, %v614_v18  ;;  %vm596_vm1 = vcmp.gt.f32.partialorder %v2756_v52, %v552_v19 }
 0x1c0   : > { %v676_v23 = vsel %vm596_vm1, 1.0, %v4094_v21 }
 0x1c1   : > { %v2259_v24 = vpack.i.bf16 %v676_v23, %v675_v22  ;;  %709 = vrot.lane.b32.xlu0 %v2906_v20, %s2571_s7 }
 0x1c2   : > { %v630_v25 = vpop.permute.xlu0 %629  ;;  %v568_v26 = vpop.permute.xlu1 %567 }
 0x1c3   : > { %v2915_v27 = vmax.f32 %v2746_v49, %v630_v25  ;;  %vm604_vm3 = vcmp.gt.f32.partialorder %v2758_v53, %v568_v26 }
 0x1c4   : > { %v684_v29 = vsel %vm604_vm3, 1.0, %v4094_v21 }
 0x1c5   : > { %v2264_v30 = vpack.i.bf16 %v684_v29, %v683_v28  ;;  %725 = vrot.lane.b32.xlu0 %v2915_v27, %s2571_s7 }
 0x1c6   : > { %v2922_v31 = vpop.permute.xlu0 %773  ;;  %v616_v32 = vpop.permute.xlu1 %615 }
 0x1c7   : > { %v2925_v33 = vmax.f32 %v2756_v52, %v616_v32 }
 0x1c9   : > { %711 = vrot.lane.b32.xlu1 %v2925_v33, %s2571_s7 }
 0x1ca   : > { %v2929_v34 = vpop.permute.xlu0 %789  ;;  %v632_v35 = vpop.permute.xlu1 %631 }
 0x1cb   : > { %v2932_v36 = vmax.f32 %v2758_v53, %v632_v35 }
 0x1cd   : > { %727 = vrot.lane.b32.xlu1 %v2932_v36, %s2571_s7 }
 0x1ce   : > { %v546_v37 = vpop.permute.xlu0 %545  ;;  %v2936_v38 = vpop.permute.xlu1 %775 }
 0x1cf   : > { %vm593_vm4 = vcmp.gt.f32.partialorder %v2752_v50, %v546_v37 }
 0x1d0   : > { %v673_v44 = vsel %vm593_vm4, 1.0, %v4094_v21 }
 0x1d2   : > { %v562_v39 = vpop.permute.xlu0 %561  ;;  %v2938_v40 = vpop.permute.xlu1 %791 }
 0x1d3   : > { %vm601_vm6 = vcmp.gt.f32.partialorder %v2754_v51, %v562_v39 }
 0x1d4   : > { %v681_v18 = vsel %vm601_vm6, 1.0, %v4094_v21 }
 0x1d6   : > { %v610_v41 = vpop.permute.xlu0 %609  ;;  %v548_v42 = vpop.permute.xlu1 %547 }
 0x1d7   : > { %v657_v43 = vmax.f32 %v2752_v50, %v610_v41  ;;  %vm594_vm5 = vcmp.gt.f32.partialorder %v2760_v54, %v548_v42 }
 0x1d8   : > { %v674_v45 = vsel %vm594_vm5, 1.0, %v4094_v21 }
 0x1d9   : > { %v2269_v46 = vpack.i.bf16 %v674_v45, %v673_v44  ;;  %705 = vrot.lane.b32.xlu0 %v657_v43, %s2571_s7 }
 0x1da   : > { %v626_v47 = vpop.permute.xlu0 %625  ;;  %v564_v16 = vpop.permute.xlu1 %563 }
 0x1db   : > { %v2948_v17 = vmax.f32 %v2754_v51, %v626_v47  ;;  %vm602_vm7 = vcmp.gt.f32.partialorder %v2762_v55, %v564_v16 }
 0x1dc   : > { %v682_v19 = vsel %vm602_vm7, 1.0, %v4094_v21 }
 0x1dd   : > { %v2274_v22 = vpack.i.bf16 %v682_v19, %v681_v18  ;;  %721 = vrot.lane.b32.xlu0 %v2948_v17, %s2571_s7 }
 0x1de   : > { %v770_v23 = vpop.permute.xlu0 %769  ;;  %v612_v25 = vpop.permute.xlu1 %611 }
 0x1df   : > { %v658_v26 = vmax.f32 %v2760_v54, %v612_v25  ;;  %v2966_v39 = vmax.f32 %v657_v43, %v770_v23 }
 0x1e1   : > { %2260 = vrot.lane.b32.xlu0 %v2259_v24, %s2567_s17  ;;  %707 = vrot.lane.b32.xlu1 %v658_v26, %s2571_s7 }
 0x1e2   : > { %v2958_v28 = vpop.permute.xlu0 %785  ;;  %v628_v29 = vpop.permute.xlu1 %627 }
 0x1e3   : > { %v2961_v32 = vmax.f32 %v2762_v55, %v628_v29 }
 0x1e5   : > { %2265 = vrot.lane.b32.xlu0 %v2264_v30, %s2567_s17  ;;  %723 = vrot.lane.b32.xlu1 %v2961_v32, %s2571_s7 }
 0x1e6   : > { %v772_v35 = vpop.permute.xlu1 %771  ;;  %v558_v37 = vpop.permute.xlu0 %557 }
 0x1e7   : > { %vm599_vm8 = vcmp.gt.f32.partialorder %v2768_v56, %v558_v37  ;;  %v2975_v44 = vmax.f32 %v658_v26, %v772_v35 }
 0x1e8   : > { %v679_v45 = vsel %vm599_vm8, 1.0, %v4094_v21 }
 0x1e9   : > { %929 = vrot.lane.b32.xlu0 %v2966_v39, %s2572_s21  ;;  %2270 = vrot.lane.b32.xlu1 %v2269_v46, %s2567_s17 }
 0x1ea   : > { %v2971_v24 = vpop.permute.xlu1 %787  ;;  %v574_v41 = vpop.permute.xlu0 %573 }
 0x1eb   : > { %vm607_vm10 = vcmp.gt.f32.partialorder %v2770_v57, %v574_v41 }
 0x1ed   : > { %2275 = vrot.lane.b32.xlu1 %v2274_v22, %s2567_s17  ;;  %v687_v22 = vsel %vm607_vm10, 1.0, %v4094_v21 }
 0x1ee   : > { %v622_v30 = vpop.permute.xlu0 %621  ;;  %v560_v42 = vpop.permute.xlu1 %559 }
 0x1ef   : > { %v663_v43 = vmax.f32 %v2768_v56, %v622_v30  ;;  %vm600_vm9 = vcmp.gt.f32.partialorder %v2780_v60, %v560_v42 }
 0x1f0   : > { %v680_v47 = vsel %vm600_vm9, 1.0, %v4094_v21 }
 0x1f1   : > { %v2279_v46 = vpack.i.bf16 %v680_v47, %v679_v45  ;;  %717 = vrot.lane.b32.xlu0 %v663_v43, %s2571_s7  ;;  %931 = vrot.lane.b32.xlu1 %v2975_v44, %s2572_s21 }
 0x1f2   : > { %v638_v16 = vpop.permute.xlu0 %637  ;;  %v576_v18 = vpop.permute.xlu1 %575 }
 0x1f3   : > { %v2986_v19 = vmax.f32 %v2770_v57, %v638_v16  ;;  %vm608_vm11 = vcmp.gt.f32.partialorder %v2782_v61, %v576_v18 }
 0x1f4   : > { %v688_v23 = vsel %vm608_vm11, 1.0, %v4094_v21 }
 0x1f5   : > { %v2284_v25 = vpack.i.bf16 %v688_v23, %v687_v22  ;;  %733 = vrot.lane.b32.xlu0 %v2986_v19, %s2571_s7 }
 0x1f6   : > { %v782_v26 = vpop.permute.xlu0 %781  ;;  %v624_v29 = vpop.permute.xlu1 %623 }
 0x1f7   : > { %v2994_v35 = vmax.f32 %v2780_v60, %v624_v29 }
 0x1f9   : > { %719 = vrot.lane.b32.xlu1 %v2994_v35, %s2571_s7 }
 0x1fa   : > { %v2998_v37 = vpop.permute.xlu0 %797  ;;  %v640_v41 = vpop.permute.xlu1 %639 }
 0x1fb   : > { %v3001_v30 = vmax.f32 %v2782_v61, %v640_v41 }
 0x1fd   : > { %735 = vrot.lane.b32.xlu1 %v3001_v30, %s2571_s7 }
 0x1fe   : > { %v554_v42 = vpop.permute.xlu0 %553  ;;  %v784_v45 = vpop.permute.xlu1 %783 }
 0x1ff   : > { %vm597_vm12 = vcmp.gt.f32.partialorder %v2776_v58, %v554_v42 }
 0x200   : > { %v677_v18 = vsel %vm597_vm12, 1.0, %v4094_v21 }
 0x201   : > { %2285 = vrot.lane.b32.xlu1 %v2284_v25, %s2567_s17 }
 0x202   : > { %v570_v47 = vpop.permute.xlu0 %569  ;;  %v556_v16 = vpop.permute.xlu1 %555 }
 0x203   : > { %vm598_vm13 = vcmp.gt.f32.partialorder %v2784_v62, %v556_v16  ;;  %vm605_vm14 = vcmp.gt.f32.partialorder %v2778_v59, %v570_v47 }
 0x204   : > { %v678_v22 = vsel %vm598_vm13, 1.0, %v4094_v21  ;;  %v685_v42 = vsel %vm605_vm14, 1.0, %v4094_v21 }
 0x205   : > { %v2289_v23 = vpack.i.bf16 %v678_v22, %v677_v18 }
 0x206   : > { %v618_v29 = vpop.permute.xlu0 %617  ;;  %v572_v41 = vpop.permute.xlu1 %571 }
 0x207   : > { %v661_v15 = vmax.f32 %v2776_v58, %v618_v29  ;;  %vm606_vm15 = vcmp.gt.f32.partialorder %v2786_v63, %v572_v41  ;;  %v3031_v29 = vmax.f32 %v2906_v20, %v2922_v31  ;;  %v3040_v41 = vmax.f32 %v663_v43, %v782_v26 }
 0x208   : > { %v686_v25 = vsel %vm606_vm15, 1.0, %v4094_v21  ;;  %v3048_v20 = vmax.f32 %v2948_v17, %v2958_v28  ;;  %v3052_v31 = vmax.f32 %v2961_v32, %v2971_v24  ;;  %v3098_v17 = vmax.f32 %v2994_v35, %v784_v45 }
 0x209   : > { %v2294_v14 = vpack.i.bf16 %v686_v25, %v685_v42  ;;  %713 = vrot.lane.b32.xlu0 %v661_v15, %s2571_s7  ;;  %v3110_v43 = vmax.f32 %v2932_v36, %v2938_v40 }
 0x20a   : > { %v634_v16 = vpop.permute.xlu0 %633  ;;  %v620_v13 = vpop.permute.xlu1 %619 }
 0x20b   : > { %v3017_v12 = vmax.f32 %v2778_v59, %v634_v16  ;;  %v662_v47 = vmax.f32 %v2784_v62, %v620_v13  ;;  %v3038_v13 = vmax.f32 %v2925_v33, %v2936_v38  ;;  %v3060_v33 = vmax.f32 %v2915_v27, %v2929_v34 }
 0x20d   : > { %729 = vrot.lane.b32.xlu0 %v3017_v12, %s2571_s7  ;;  %715 = vrot.lane.b32.xlu1 %v662_v47, %s2571_s7 }
 0x20e   : > { %v636_v18 = vpop.permute.xlu1 %635  ;;  %v778_v27 = vpop.permute.xlu0 %777 }
 0x20f   : > { %v3024_v22 = vmax.f32 %v2786_v63, %v636_v18 }
 0x211   : > { %2280 = vrot.lane.b32.xlu0 %v2279_v46, %s2567_s17  ;;  %731 = vrot.lane.b32.xlu1 %v3024_v22, %s2571_s7 }
 0x212   : > { %v3087_v34 = vpop.permute.xlu0 %793  ;;  %v780_v28 = vpop.permute.xlu1 %779 }
 0x215   : > { %933 = vrot.lane.b32.xlu0 %v3031_v29, %s2572_s21  ;;  %2290 = vrot.lane.b32.xlu1 %v2289_v23, %s2567_s17 }
 0x216   : > { %v3093_v38 = vpop.permute.xlu0 %799  ;;  %v3104_v24 = vpop.permute.xlu1 %795 }
 0x219   : > { %941 = vrot.lane.b32.xlu0 %v3040_v41, %s2572_s21  ;;  %935 = vrot.lane.b32.xlu1 %v3038_v13, %s2572_s21 }
 0x21d   : > { %945 = vrot.lane.b32.xlu0 %v3048_v20, %s2572_s21  ;;  %947 = vrot.lane.b32.xlu1 %v3052_v31, %s2572_s21 }
 0x221   : > { %949 = vrot.lane.b32.xlu0 %v3060_v33, %s2572_s21  ;;  %993 = vrot.lane.b32.xlu1 %v2752_v50, %s2573_s24 }
 0x225   : > { %995 = vrot.lane.b32.xlu0 %v2760_v54, %s2573_s24  ;;  %2295 = vrot.lane.b32.xlu1 %v2294_v14, %s2567_s17  ;;  %v3085_v14 = vmax.f32 %v661_v15, %v778_v27  ;;  %v3102_v15 = vmax.f32 %v662_v47, %v780_v28 }
 0x229   : > { %1003 = vrot.lane.b32.xlu0 %v2784_v62, %s2573_s24  ;;  %997 = vrot.lane.b32.xlu1 %v2744_v48, %s2573_s24 }
 0x22d   : > { %1005 = vrot.lane.b32.xlu0 %v2768_v56, %s2573_s24  ;;  %999 = vrot.lane.b32.xlu1 %v2756_v52, %s2573_s24 }
 0x231   : > { %1011 = vrot.lane.b32.xlu0 %v2762_v55, %s2573_s24  ;;  %1001 = vrot.lane.b32.xlu1 %v2776_v58, %s2573_s24 }
 0x233   : > { %v710_v32 = vpop.permute.xlu0 %709 }
 0x234   : > { %vm755_vm0 = vcmp.gt.f32.partialorder %v2744_v48, %v710_v32 }
 0x235   : > { %1013 = vrot.lane.b32.xlu0 %v2746_v49, %s2573_s24  ;;  %1007 = vrot.lane.b32.xlu1 %v2780_v60, %s2573_s24 }
 0x237   : > { %v726_v46 = vpop.permute.xlu0 %725 }
 0x238   : > { %vm763_vm2 = vcmp.gt.f32.partialorder %v2746_v49, %v726_v46 }
 0x239   : > { %937 = vrot.lane.b32.xlu0 %v3085_v14, %s2572_s21  ;;  %1009 = vrot.lane.b32.xlu1 %v2754_v51, %s2573_s24 }
 0x23b   : > { %v712_v26 = vpop.permute.xlu1 %711 }
 0x23c   : > { %vm756_vm1 = vcmp.gt.f32.partialorder %v2756_v52, %v712_v26 }
 0x23d   : > { %1015 = vrot.lane.b32.xlu1 %v2758_v53, %s2573_s24 }
 0x23f   : > { %v728_v45 = vpop.permute.xlu1 %727 }
 0x240   : > { %vm764_vm3 = vcmp.gt.f32.partialorder %v2758_v53, %v728_v45 }
 0x241   : > { %943 = vrot.lane.b32.xlu1 %v3098_v17, %s2572_s21 }
 0x245   : > { %939 = vrot.lane.b32.xlu1 %v3102_v15, %s2572_s21 }
 0x249   : > { %951 = vrot.lane.b32.xlu1 %v3110_v43, %s2572_s21 }
 0x24b   : > { %v706_v35 = vpop.permute.xlu0 %705 }
 0x24c   : > { %vm753_vm5 = vcmp.gt.f32.partialorder %v2752_v50, %v706_v35 }
 0x24f   : > { %v722_v23 = vpop.permute.xlu0 %721 }
 0x250   : > { %vm761_vm7 = vcmp.gt.f32.partialorder %v2754_v51, %v722_v23 }
 0x253   : > { %v2261_v42 = vpop.permute.xlu0 %2260  ;;  %v708_v25 = vpop.permute.xlu1 %707 }
 0x254   : > { %v2263_v16 = vunpack.i.h.bf16 %v2261_v42  ;;  %v2262_v47 = vunpack.i.l.bf16 %v2261_v42  ;;  %vm754_vm6 = vcmp.gt.f32.partialorder %v2760_v54, %v708_v25 }
 0x256   : > { %v899_v18 = vsel %vm755_vm0, 2.0, %v2262_v47  ;;  %v900_v27 = vsel %vm756_vm1, 2.0, %v2263_v16 }
 0x257   : > { %v2299_v36 = vpack.i.bf16 %v900_v27, %v899_v18  ;;  %v2266_v40 = vpop.permute.xlu0 %2265  ;;  %v724_v28 = vpop.permute.xlu1 %723 }
 0x258   : > { %v2268_v21 = vunpack.i.h.bf16 %v2266_v40  ;;  %v2267_v11 = vunpack.i.l.bf16 %v2266_v40  ;;  %vm762_vm8 = vcmp.gt.f32.partialorder %v2762_v55, %v724_v28 }
 0x259   : > { %2300 = vrot.lane.b32.xlu0 %v2299_v36, %s2567_s17 }
 0x25a   : > { %v907_v10 = vsel %vm763_vm2, 2.0, %v2267_v11  ;;  %v908_v9 = vsel %vm764_vm3, 2.0, %v2268_v21 }
 0x25b   : > { %v2309_v42 = vpack.i.bf16 %v908_v9, %v907_v10  ;;  %v3119_v8 = vpop.permute.xlu0 %929  ;;  %v2271_v32 = vpop.permute.xlu1 %2270 }
 0x25c   : > { %vm977_vm4 = vcmp.gt.f32.partialorder %v2752_v50, %v3119_v8  ;;  %v2273_v26 = vunpack.i.h.bf16 %v2271_v32  ;;  %v2272_v16 = vunpack.i.l.bf16 %v2271_v32 }
 0x25e   : > { %v898_v46 = vsel %vm754_vm6, 2.0, %v2273_v26  ;;  %v897_v47 = vsel %vm753_vm5, 2.0, %v2272_v16 }
 0x25f   : > { %v2304_v45 = vpack.i.bf16 %v898_v46, %v897_v47  ;;  %v2276_v18 = vpop.permute.xlu1 %2275 }
 0x260   : > { %v2278_v27 = vunpack.i.h.bf16 %v2276_v18  ;;  %v2277_v11 = vunpack.i.l.bf16 %v2276_v18 }
 0x261   : > { %2305 = vrot.lane.b32.xlu0 %v2304_v45, %s2567_s17 }
 0x262   : > { %v906_v9 = vsel %vm762_vm8, 2.0, %v2278_v27  ;;  %v905_v10 = vsel %vm761_vm7, 2.0, %v2277_v11 }
 0x263   : > { %v2314_v21 = vpack.i.bf16 %v906_v9, %v905_v10  ;;  %v3128_v36 = vpop.permute.xlu1 %931  ;;  %v718_v23 = vpop.permute.xlu0 %717 }
 0x264   : > { %vm978_vm9 = vcmp.gt.f32.partialorder %v2760_v54, %v3128_v36  ;;  %vm759_vm12 = vcmp.gt.f32.partialorder %v2768_v56, %v718_v23 }
 0x265   : > { %2315 = vrot.lane.b32.xlu1 %v2314_v21, %s2567_s17  ;;  %2310 = vrot.lane.b32.xlu0 %v2309_v42, %s2567_s17 }
 0x267   : > { %v734_v40 = vpop.permute.xlu0 %733 }
 0x268   : > { %vm767_vm10 = vcmp.gt.f32.partialorder %v2770_v57, %v734_v40 }
 0x269   : > { %1017 = vrot.lane.b32.xlu0 %v2778_v59, %s2573_s24 }
 0x26b   : > { %v720_v35 = vpop.permute.xlu1 %719 }
 0x26c   : > { %vm760_vm13 = vcmp.gt.f32.partialorder %v2780_v60, %v720_v35 }
 0x26f   : > { %v736_v25 = vpop.permute.xlu1 %735 }
 0x270   : > { %vm768_vm11 = vcmp.gt.f32.partialorder %v2782_v61, %v736_v25 }
 0x273   : > { %v2286_v28 = vpop.permute.xlu1 %2285 }
 0x274   : > { %v2288_v32 = vunpack.i.h.bf16 %v2286_v28  ;;  %v2287_v26 = vunpack.i.l.bf16 %v2286_v28 }
 0x276   : > { %v912_v16 = vsel %vm768_vm11, 2.0, %v2288_v32  ;;  %v911_v46 = vsel %vm767_vm10, 2.0, %v2287_v26 }
 0x277   : > { %v2329_v47 = vpack.i.bf16 %v912_v16, %v911_v46 }
 0x27b   : > { %v714_v45 = vpop.permute.xlu0 %713 }
 0x27c   : > { %vm757_vm14 = vcmp.gt.f32.partialorder %v2776_v58, %v714_v45  ;;  %v3162_v45 = vmax.f32 %v3024_v22, %v3104_v24 }
 0x27f   : > { %v730_v18 = vpop.permute.xlu0 %729  ;;  %v716_v42 = vpop.permute.xlu1 %715 }
 0x280   : > { %vm758_vm15 = vcmp.gt.f32.partialorder %v2784_v62, %v716_v42  ;;  %vm765_vm3 = vcmp.gt.f32.partialorder %v2778_v59, %v730_v18  ;;  %v3197_v18 = vmax.f32 %v3001_v30, %v3093_v38 }
 0x283   : > { %v2281_v27 = vpop.permute.xlu0 %2280  ;;  %v732_v11 = vpop.permute.xlu1 %731 }
 0x284   : > { %v2283_v9 = vunpack.i.h.bf16 %v2281_v27  ;;  %v2282_v10 = vunpack.i.l.bf16 %v2281_v27  ;;  %vm766_vm5 = vcmp.gt.f32.partialorder %v2786_v63, %v732_v11 }
 0x286   : > { %v903_v21 = vsel %vm759_vm12, 2.0, %v2282_v10  ;;  %v904_v28 = vsel %vm760_vm13, 2.0, %v2283_v9 }
 0x287   : > { %v2319_v7 = vpack.i.bf16 %v904_v28, %v903_v21  ;;  %v3140_v40 = vpop.permute.xlu0 %933  ;;  %v2291_v25 = vpop.permute.xlu1 %2290 }
 0x288   : > { %v2293_v32 = vunpack.i.h.bf16 %v2291_v25  ;;  %v2292_v26 = vunpack.i.l.bf16 %v2291_v25  ;;  %vm979_vm6 = vcmp.gt.f32.partialorder %v2744_v48, %v3140_v40 }
 0x289   : > { %2320 = vrot.lane.b32.xlu0 %v2319_v7, %s2567_s17  ;;  %v3158_v7 = vmax.f32 %v3017_v12, %v3087_v34  ;;  %v3176_v12 = vmax.f32 %v2986_v19, %v2998_v37 }
 0x28a   : > { %v902_v16 = vsel %vm758_vm15, 2.0, %v2293_v32  ;;  %v901_v46 = vsel %vm757_vm14, 2.0, %v2292_v26 }
 0x28b   : > { %v2324_v27 = vpack.i.bf16 %v902_v16, %v901_v46  ;;  %v3145_v23 = vpop.permute.xlu0 %941  ;;  %v3147_v35 = vpop.permute.xlu1 %935 }
 0x28c   : > { %vm983_vm0 = vcmp.gt.f32.partialorder %v2768_v56, %v3145_v23  ;;  %vm980_vm1 = vcmp.gt.f32.partialorder %v2756_v52, %v3147_v35 }
 0x28d   : > { %2325 = vrot.lane.b32.xlu1 %v2324_v27, %s2567_s17  ;;  %1019 = vrot.lane.b32.xlu0 %v2786_v63, %s2573_s24 }
 0x28f   : > { %v3164_v42 = vpop.permute.xlu0 %945  ;;  %v3166_v9 = vpop.permute.xlu1 %947 }
 0x290   : > { %vm986_vm2 = vcmp.gt.f32.partialorder %v2762_v55, %v3166_v9  ;;  %vm985_vm7 = vcmp.gt.f32.partialorder %v2754_v51, %v3164_v42 }
 0x291   : > { %953 = vrot.lane.b32.xlu1 %v3158_v7, %s2572_s21  ;;  %955 = vrot.lane.b32.xlu0 %v3162_v45, %s2572_s21 }
 0x293   : > { %v994_v34 = vpop.permute.xlu1 %993  ;;  %v3178_v22 = vpop.permute.xlu0 %949 }
 0x294   : > { %v3190_v28 = vmax.f32 %v2966_v39, %v994_v34  ;;  %vm987_vm8 = vcmp.gt.f32.partialorder %v2746_v49, %v3178_v22 }
 0x295   : > { %1021 = vrot.lane.b32.xlu1 %v2770_v57, %s2573_s24  ;;  %957 = vrot.lane.b32.xlu0 %v3176_v12, %s2572_s21 }
 0x296   : > { %4128 = vst [vmem:[#allocation20_spill] sm:$0xff] %v3190_v28 }
 0x297   : > { %v2296_v24 = vpop.permute.xlu1 %2295  ;;  %v996_v25 = vpop.permute.xlu0 %995 }
 0x298   : > { %v2298_v10 = vunpack.i.h.bf16 %v2296_v24  ;;  %v2297_v21 = vunpack.i.l.bf16 %v2296_v24  ;;  %v3202_v39 = vmax.f32 %v2975_v44, %v996_v25 }
 0x299   : > { %1023 = vrot.lane.b32.xlu1 %v2782_v61, %s2573_s24  ;;  %2330 = vrot.lane.b32.xlu0 %v2329_v47, %s2567_s17 }
 0x29a   : > { %v910_v19 = vsel %vm766_vm5, 2.0, %v2298_v10  ;;  %v909_v37 = vsel %vm765_vm3, 2.0, %v2297_v21  ;;  %vm1509_vm5 = vcmask 326912  }
 0x29b   : > { %v2334_v32 = vpack.i.bf16 %v910_v19, %v909_v37  ;;  %v998_v26 = vpop.permute.xlu1 %997  ;;  %v1004_v47 = vpop.permute.xlu0 %1003 }
 0x29c   : > { %v3212_v30 = vmax.f32 %v3031_v29, %v998_v26  ;;  %v3215_v34 = vmax.f32 %v3102_v15, %v1004_v47 }
 0x29d   : > { %2335 = vrot.lane.b32.xlu1 %v2334_v32, %s2567_s17  ;;  %1153 = vrot.lane.b32.xlu0 %v3190_v28, %s2574_s23 }
 0x29e   : > { %4130 = vst [vmem:[#allocation22_spill] sm:$0xff] %v3212_v30  ;;  %4131 = vst [vmem:[#allocation23_spill] sm:$0xff] %v3215_v34 }
 0x29f   : > { %v1000_v11 = vpop.permute.xlu1 %999  ;;  %v1006_v38 = vpop.permute.xlu0 %1005 }
 0x2a0   : > { %v3222_v44 = vmax.f32 %v3038_v13, %v1000_v11  ;;  %v3232_v15 = vmax.f32 %v3040_v41, %v1006_v38 }
 0x2a1   : > { %959 = vrot.lane.b32.xlu1 %v3197_v18, %s2572_s21 }
 0x2a2   : > { %4132 = vst [vmem:[#allocation24_spill] sm:$0xff] %v3222_v44  ;;  %4134 = vst [vmem:[#allocation26_spill] sm:$0xff] %v3232_v15 }
 0x2a3   : > { %v1002_v16 = vpop.permute.xlu1 %1001  ;;  %v1012_v29 = vpop.permute.xlu0 %1011 }
 0x2a4   : > { %v3205_v46 = vmax.f32 %v3085_v14, %v1002_v16  ;;  %v3235_v10 = vmax.f32 %v3052_v31, %v1012_v29 }
 0x2a5   : > { %1155 = vrot.lane.b32.xlu1 %v3202_v39, %s2574_s23 }
 0x2a6   : > { %4129 = vst [vmem:[#allocation21_spill] sm:$0xff] %v3205_v46  ;;  %1161 = vrot.lane.b32.xlu0 %v3205_v46, %s2574_s23  ;;  %4135 = vst [vmem:[#allocation27_spill] sm:$0xff] %v3235_v10 }
 0x2a7   : > { %v1008_v27 = vpop.permute.xlu1 %1007 }
 0x2a8   : > { %v3242_v13 = vmax.f32 %v3098_v17, %v1008_v27 }
 0x2a9   : > { %1157 = vrot.lane.b32.xlu1 %v3212_v30, %s2574_s23 }
 0x2aa   : > { %1163 = vrot.lane.b32.xlu0 %v3215_v34, %s2574_s23  ;;  %4136 = vst [vmem:[#allocation28_spill] sm:$0xff] %v3242_v13 }
 0x2ab   : > { %v1010_v14 = vpop.permute.xlu1 %1009 }
 0x2ac   : > { %v3225_v24 = vmax.f32 %v3048_v20, %v1010_v14  ;;  %v1014_v20 = vpop.permute.xlu0 %1013 }
 0x2ad   : > { %1159 = vrot.lane.b32.xlu1 %v3222_v44, %s2574_s23  ;;  %v3247_v21 = vmax.f32 %v3060_v33, %v1014_v20 }
 0x2ae   : > { %4133 = vst [vmem:[#allocation25_spill] sm:$0xff] %v3225_v24  ;;  %1169 = vrot.lane.b32.xlu0 %v3225_v24, %s2574_s23 }
 0x2af   : > { %4137 = vst [vmem:[#allocation29_spill] sm:$0xff] %v3247_v21  ;;  %v1016_v41 = vpop.permute.xlu1 %1015 }
 0x2b0   : > { %v3252_v31 = vmax.f32 %v3110_v43, %v1016_v41  ;;  %v938_v19 = vpop.permute.xlu0 %937 }
 0x2b1   : > { %1165 = vrot.lane.b32.xlu1 %v3232_v15, %s2574_s23 }
 0x2b2   : > { %1171 = vrot.lane.b32.xlu0 %v3235_v10, %s2574_s23  ;;  %4138 = vst [vmem:[#allocation30_spill] sm:$0xff] %v3252_v31 }
 0x2b3   : > { %v944_v17 = vpop.permute.xlu1 %943 }
 0x2b5   : > { %1167 = vrot.lane.b32.xlu1 %v3242_v13, %s2574_s23 }
 0x2b7   : > { %v940_v33 = vpop.permute.xlu1 %939 }
 0x2b8   : > { %vm982_vm11 = vcmp.gt.f32.partialorder %v2784_v62, %v940_v33 }
 0x2b9   : > { %1173 = vrot.lane.b32.xlu1 %v3247_v21, %s2574_s23 }
 0x2bb   : > { %v952_v43 = vpop.permute.xlu1 %951 }
 0x2bc   : > { %vm988_vm10 = vcmp.gt.f32.partialorder %v2758_v53, %v952_v43 }
 0x2bd   : > { %1175 = vrot.lane.b32.xlu1 %v3252_v31, %s2574_s23 }
 0x2cb   : > { %v2301_v37 = vpop.permute.xlu0 %2300 }
 0x2cc   : > { %v2303_v25 = vunpack.i.h.bf16 %v2301_v37  ;;  %v2302_v32 = vunpack.i.l.bf16 %v2301_v37 }
 0x2ce   : > { %v1123_v26 = vsel %vm979_vm6, 3.0, %v2302_v32  ;;  %v1124_v11 = vsel %vm980_vm1, 3.0, %v2303_v25 }
 0x2cf   : > { %v2339_v47 = vpack.i.bf16 %v1124_v11, %v1123_v26 }
 0x2d1   : > { %2340 = vrot.lane.b32.xlu0 %v2339_v47, %s2567_s17 }
 0x2d3   : > { %v2306_v16 = vpop.permute.xlu0 %2305 }
 0x2d4   : > { %v2308_v38 = vunpack.i.h.bf16 %v2306_v16  ;;  %v2307_v27 = vunpack.i.l.bf16 %v2306_v16 }
 0x2d6   : > { %v1122_v14 = vsel %vm978_vm9, 3.0, %v2308_v38  ;;  %v1121_v40 = vsel %vm977_vm4, 3.0, %v2307_v27  ;;  %vm984_vm4 = vcmp.gt.f32.partialorder %v2780_v60, %v944_v17  ;;  %vm981_vm9 = vcmp.gt.f32.partialorder %v2776_v58, %v938_v19 }
 0x2d7   : > { %v2349_v29 = vpack.i.bf16 %v1122_v14, %v1121_v40  ;;  %v2316_v20 = vpop.permute.xlu1 %2315  ;;  %v2311_v41 = vpop.permute.xlu0 %2310 }
 0x2d8   : > { %v2318_v35 = vunpack.i.h.bf16 %v2316_v20  ;;  %v2317_v37 = vunpack.i.l.bf16 %v2316_v20  ;;  %v2313_v25 = vunpack.i.h.bf16 %v2311_v41  ;;  %v2312_v32 = vunpack.i.l.bf16 %v2311_v41 }
 0x2da   : > { %v1130_v8 = vsel %vm986_vm2, 3.0, %v2318_v35  ;;  %v1129_v36 = vsel %vm985_vm7, 3.0, %v2317_v37  ;;  %v1132_v26 = vsel %vm988_vm10, 3.0, %v2313_v25  ;;  %v1131_v11 = vsel %vm987_vm8, 3.0, %v2312_v32 }
 0x2db   : > { %v2354_v47 = vpack.i.bf16 %v1130_v8, %v1129_v36  ;;  %v2344_v16 = vpack.i.bf16 %v1132_v26, %v1131_v11  ;;  %v1018_v38 = vpop.permute.xlu0 %1017 }
 0x2dc   : > { %v3280_v42 = vmax.f32 %v3158_v7, %v1018_v38 }
 0x2dd   : > { %2355 = vrot.lane.b32.xlu1 %v2354_v47, %s2567_s17  ;;  %2345 = vrot.lane.b32.xlu0 %v2344_v16, %s2567_s17 }
 0x2de   : > { %4139 = vst [vmem:[#allocation31_spill] sm:$0xff] %v3280_v42 }
 0x2e1   : > { %2350 = vrot.lane.b32.xlu0 %v2349_v29, %s2567_s17 }
 0x2e5   : > { %1177 = vrot.lane.b32.xlu0 %v3280_v42, %s2574_s23 }
 0x2fb   : > { %v2321_v9 = vpop.permute.xlu0 %2320 }
 0x2fc   : > { %v2323_v22 = vunpack.i.h.bf16 %v2321_v9  ;;  %v2322_v43 = vunpack.i.l.bf16 %v2321_v9 }
 0x2fe   : > { %v1128_v27 = vsel %vm984_vm4, 3.0, %v2323_v22  ;;  %v1127_v14 = vsel %vm983_vm0, 3.0, %v2322_v43 }
 0x2ff   : > { %v2359_v40 = vpack.i.bf16 %v1128_v27, %v1127_v14  ;;  %v2326_v20 = vpop.permute.xlu1 %2325  ;;  %v1020_v41 = vpop.permute.xlu0 %1019 }
 0x300   : > { %v2328_v29 = vunpack.i.h.bf16 %v2326_v20  ;;  %v2327_v35 = vunpack.i.l.bf16 %v2326_v20  ;;  %v3292_v17 = vmax.f32 %v3162_v45, %v1020_v41 }
 0x301   : > { %2360 = vrot.lane.b32.xlu0 %v2359_v40, %s2567_s17 }
 0x302   : > { %v1126_v7 = vsel %vm982_vm11, 3.0, %v2328_v29  ;;  %v1125_v37 = vsel %vm981_vm9, 3.0, %v2327_v35  ;;  %4140 = vst [vmem:[#allocation32_spill] sm:$0xff] %v3292_v17 }
 0x303   : > { %v2364_v25 = vpack.i.bf16 %v1126_v7, %v1125_v37  ;;  %v954_v32 = vpop.permute.xlu1 %953  ;;  %v956_v23 = vpop.permute.xlu0 %955 }
 0x304   : > { %vm989_vm12 = vcmp.gt.f32.partialorder %v2778_v59, %v954_v32  ;;  %vm990_vm13 = vcmp.gt.f32.partialorder %v2786_v63, %v956_v23  ;;  %v497_v32 = vmax.f32 %v2846_v1, 1e-16  ;;  %v500_v23 = vmax.f32 %v2856_v2, 1e-16  ;;  %v4143_v2 = vld [vmem:[#allocation11_spill] sm:$0xff] }
 0x305   : > { %2365 = vrot.lane.b32.xlu1 %v2364_v25, %s2567_s17  ;;  %1179 = vrot.lane.b32.xlu0 %v3292_v17, %s2574_s23  ;;  %v499_v25 = vmax.f32 %v2844_v0, 1e-16  ;;  %v501_v0 = vmax.f32 %v2866_v5, 1e-16  ;;  %v504_v1 = vmax.f32 %v2876_v6, 1e-16 }
 0x306   : > { %v4146_v5 = vld [vmem:[#allocation14_spill] sm:$0xff] }
 0x307   : > { %v1022_v8 = vpop.permute.xlu1 %1021  ;;  %v958_v33 = vpop.permute.xlu0 %957  ;;  %2403 = vrsqrt.f32 %v499_v25  ;;  %v508_v6 = vmax.f32 %v4146_v5, 1e-16  ;;  %v3382_v25 = vstv %s2039_s27 }
 0x308   : > { %v3298_v19 = vmax.f32 %v3176_v12, %v1022_v8  ;;  %vm991_vm14 = vcmp.gt.f32.partialorder %v2770_v57, %v958_v33  ;;  %v498_v8 = vmax.f32 %v2858_v3, 1e-16  ;;  %v502_v33 = vmax.f32 %v2864_v4, 1e-16  ;;  %v4145_v4 = vld [vmem:[#allocation13_spill] sm:$0xff] }
 0x309   : > { %2405 = vrsqrt.f32 %v497_v32  ;;  %v503_v3 = vmax.f32 %v4143_v2, 1e-16 }
 0x30a   : > { %4141 = vst [vmem:[#allocation33_spill] sm:$0xff] %v3298_v19  ;;  %1181 = vrot.lane.b32.xlu1 %v3298_v19, %s2574_s23  ;;  %2407 = vrsqrt.f32 %v500_v23  ;;  %v4150_v23 = vld [vmem:[#allocation17_spill] sm:$0xff] }
 0x30b   : > { %v1024_v36 = vpop.permute.xlu1 %1023  ;;  %v2331_v45 = vpop.permute.xlu0 %2330  ;;  %2409 = vrsqrt.f32 %v498_v8  ;;  %v509_v8 = vmax.f32 %v4150_v23, 1e-16 }
 0x30c   : > { %v3303_v26 = vmax.f32 %v3197_v18, %v1024_v36  ;;  %v2332_v12 = vunpack.i.l.bf16 %v2331_v45  ;;  %v2333_v18 = vunpack.i.h.bf16 %v2331_v45  ;;  %2411 = vrsqrt.f32 %v502_v33 }
 0x30d   : > { %2413 = vrsqrt.f32 %v501_v0 }
 0x30e   : > { %4142 = vst [vmem:[#allocation34_spill] sm:$0xff] %v3303_v26  ;;  %1183 = vrot.lane.b32.xlu1 %v3303_v26, %s2574_s23  ;;  %v1135_v27 = vsel %vm991_vm14, 3.0, %v2332_v12  ;;  %2415 = vrsqrt.f32 %v504_v1 }
 0x30f   : > { %v2336_v11 = vpop.permute.xlu1 %2335  ;;  %v3333_v41 = vpop.permute.xlu0 %1153  ;;  %2417 = vrsqrt.f32 %v503_v3 }
 0x310   : > { %v2338_v47 = vunpack.i.h.bf16 %v2336_v11  ;;  %v2337_v16 = vunpack.i.l.bf16 %v2336_v11  ;;  %v1395_v11 = vlaneseq }
 0x311   : > { %v3384_v32 = vpop.eup %2403 }
 0x312   : > { %v1133_v38 = vsel %vm989_vm12, 3.0, %v2337_v16  ;;  %v1134_v9 = vsel %vm990_vm13, 3.0, %v2338_v47  ;;  %1219 = vrot.lane.b32.xlu1 %v2760_v54, %s2575_s15  ;;  %v4144_v47 = vld [vmem:[#allocation12_spill] sm:$0xff]  ;;  %v3370_v12 = vshrl.u32 %v1395_v11, 7  ;;  %4149 = vst [vmem:[#allocation11_spill] sm:$0xff] %v3384_v32 }
 0x313   : > { %v2374_v22 = vpack.i.bf16 %v1134_v9, %v1133_v38  ;;  %v960_v43 = vpop.permute.xlu1 %959  ;;  %v506_v16 = vmax.f32 %v4144_v47, 1e-16  ;;  %v505_v38 = vmax.f32 %v4145_v4, 1e-16  ;;  %v3390_v2 = vpop.eup %2405  ;;  %v4153_v47 = vld [vmem:[#allocation18_spill] sm:$0xff] }
 0x314   : > { %vm992_vm15 = vcmp.gt.f32.partialorder %v2782_v61, %v960_v43  ;;  %v1398_v33 = vadd.s32 16, %v3370_v12  ;;  %v1404_v0 = vadd.s32 64, %v3370_v12  ;;  %v1405_v1 = vadd.s32 72, %v3370_v12  ;;  %4151 = vst [vmem:[#allocation12_spill] sm:$0xff] %v3390_v2  ;;  %v3392_v3 = vpop.eup %2407 }
 0x315   : > { %v1136_v14 = vsel %vm992_vm15, 3.0, %v2333_v18  ;;  %2419 = vrsqrt.f32 %v506_v16  ;;  %4152 = vst [vmem:[#allocation13_spill] sm:$0xff] %v3392_v3  ;;  %v512_v16 = vmax.f32 %v4153_v47, 1e-16  ;;  %v1403_v21 = vadd.s32 56, %v3370_v12 }
 0x316   : > { %v2369_v40 = vpack.i.bf16 %v1136_v14, %v1135_v27  ;;  %2375 = vrot.lane.b32.xlu1 %v2374_v22, %s2567_s17  ;;  %v4147_v22 = vld [vmem:[#allocation15_spill] sm:$0xff]  ;;  %v1399_v27 = vadd.s32 24, %v3370_v12  ;;  %2421 = vrsqrt.f32 %v505_v38  ;;  %v4148_v14 = vld [vmem:[#allocation16_spill] sm:$0xff]  ;;  %v3405_v42 = vadd.s32 %v3382_v25, %v1404_v0 }
 0x317   : > { %v3329_v20 = vpop.permute.xlu1 %1155  ;;  %v507_v43 = vmax.f32 %v4147_v22, 1e-16  ;;  %2423 = vrsqrt.f32 %v508_v6  ;;  %v3398_v22 = vpop.eup %2409  ;;  %v1415_v6 = vadd.s32 %v3382_v25, %v1398_v33  ;;  %v1397_v33 = vadd.s32 8, %v3370_v12 }
 0x318   : > { %2370 = vrot.lane.b32.xlu0 %v2369_v40, %s2567_s17  ;;  %v3339_v29 = vpop.permute.xlu0 %1161  ;;  %v510_v40 = vmax.f32 %v4148_v14, 1e-16  ;;  %v1416_v38 = vadd.s32 %v3382_v25, %v1399_v27  ;;  %v4154_v14 = vld [vmem:[#allocation19_spill] sm:$0xff]  ;;  %v3401_v19 = vpop.eup %2411  ;;  %vm1437_vm6 = vcmp.lt.s32.totalorder %v3405_v42, 250 }
 0x319   : > { %2425 = vrsqrt.f32 %v507_v43  ;;  %v511_v23 = vmax.f32 %v4154_v14, 1e-16  ;;  %4155 = vst [vmem:[#allocation14_spill] sm:$0xff] %v3401_v19  ;;  %v3408_v43 = vadd.s32 %v3382_v25, %v1405_v1  ;;  %v3410_v47 = vpop.eup %2413  ;;  %v1407_v14 = vadd.s32 88, %v3370_v12 }
 0x31a   : > { %1223 = vrot.lane.b32.xlu1 %v2756_v52, %s2575_s15  ;;  %2427 = vrsqrt.f32 %v510_v40  ;;  %4156 = vst [vmem:[#allocation15_spill] sm:$0xff] %v3410_v47  ;;  %v1406_v40 = vadd.s32 80, %v3370_v12  ;;  %v3416_v26 = vpop.eup %2415  ;;  %vm1432_vm1 = vcmp.lt.s32.totalorder %v1416_v38, 250  ;;  %v1402_v1 = vadd.s32 48, %v3370_v12 }
 0x31b   : > { %v3341_v35 = vpop.permute.xlu1 %1157  ;;  %2429 = vrsqrt.f32 %v509_v8  ;;  %4157 = vst [vmem:[#allocation16_spill] sm:$0xff] %v3416_v26  ;;  %v3419_v0 = vpop.eup %2417  ;;  %vm1431_vm3 = vcmp.lt.s32.totalorder %v1415_v6, 250  ;;  %vm1438_vm7 = vcmp.lt.s32.totalorder %v3408_v43, 250  ;;  %v3448_v31 = vadd.s32 %v3382_v25, %v1397_v33 }
 0x31c   : > { %1217 = vrot.lane.b32.xlu0 %v2752_v50, %s2575_s15  ;;  %v3349_v7 = vpop.permute.xlu0 %1163  ;;  %2431 = vrsqrt.f32 %v512_v16  ;;  %4158 = vst [vmem:[#allocation17_spill] sm:$0xff] %v3419_v0  ;;  %vm1203_vm2 = vcmp.gt.f32.partialorder %v2744_v48, %v3341_v35  ;;  %v1401_v16 = vadd.s32 40, %v3370_v12  ;;  %v3438_v0 = vadd.s32 %v3382_v25, %v1406_v40 }
 0x31d   : > { %2433 = vrsqrt.f32 %v511_v23  ;;  %v3445_v35 = vadd.s32 %v3382_v25, %v3370_v12  ;;  %v1409_v38 = vadd.s32 104, %v3370_v12  ;;  %v3458_v40 = vadd.s32 %v3382_v25, %v1403_v21 }
 0x31e   : > { %1227 = vrot.lane.b32.xlu1 %v2784_v62, %s2575_s15  ;;  %v3468_v47 = vadd.s32 %v3382_v25, %v1401_v16 }
 0x31f   : > { %v3351_v37 = vpop.permute.xlu1 %1159 }
 0x320   : > { %1221 = vrot.lane.b32.xlu0 %v2744_v48, %s2575_s15  ;;  %v3362_v36 = vpop.permute.xlu0 %1169  ;;  %vm1204_vm0 = vcmp.gt.f32.partialorder %v2756_v52, %v3351_v37  ;;  %v1400_v52 = vadd.s32 32, %v3370_v12  ;;  %v3424_v37 = vpop.eup %2419  ;;  %v3441_v48 = vadd.s32 %v3382_v25, %v1407_v14 }
 0x321   : > { %4159 = vst [vmem:[#allocation18_spill] sm:$0xff] %v3424_v37  ;;  %v3432_v23 = vpop.eup %2421  ;;  %v1411_v37 = vadd.s32 120, %v3370_v12  ;;  %vm1209_vm9 = vcmp.gt.f32.partialorder %v2754_v51, %v3362_v36 }
 0x322   : > { %1231 = vrot.lane.b32.xlu1 %v2780_v60, %s2575_s15  ;;  %4160 = vst [vmem:[#allocation19_spill] sm:$0xff] %v3432_v23  ;;  %v3455_v23 = vadd.s32 %v3382_v25, %v1402_v1  ;;  %v3461_v14 = vadd.s32 %v3382_v25, %v1400_v52  ;;  %vm1440_vm12 = vcmp.lt.s32.totalorder %v3441_v48, 250 }
 0x323   : > { %v3364_v45 = vpop.permute.xlu1 %1165 }
 0x324   : > { %1225 = vrot.lane.b32.xlu0 %v2776_v58, %s2575_s15  ;;  %v3373_v9 = vpop.permute.xlu0 %1171 }
 0x325   : > { %vm1210_vm13 = vcmp.gt.f32.partialorder %v2762_v55, %v3373_v9 }
 0x326   : > { %1235 = vrot.lane.b32.xlu1 %v2762_v55, %s2575_s15 }
 0x327   : > { %v3375_v18 = vpop.permute.xlu1 %1167 }
 0x328   : > { %1229 = vrot.lane.b32.xlu0 %v2768_v56, %s2575_s15 }
 0x32a   : > { %1239 = vrot.lane.b32.xlu1 %v2758_v53, %s2575_s15 }
 0x32b   : > { %v3395_v4 = vpop.permute.xlu1 %1173 }
 0x32c   : > { %1233 = vrot.lane.b32.xlu0 %v2754_v51, %s2575_s15 }
 0x32e   : > { %1243 = vrot.lane.b32.xlu1 %v2786_v63, %s2575_s15 }
 0x330   : > { %1237 = vrot.lane.b32.xlu0 %v2746_v49, %s2575_s15 }
 0x332   : > { %1247 = vrot.lane.b32.xlu1 %v2782_v61, %s2575_s15 }
 0x334   : > { %1241 = vrot.lane.b32.xlu0 %v2778_v59, %s2575_s15 }
 0x338   : > { %1245 = vrot.lane.b32.xlu0 %v2770_v57, %s2575_s15 }
 0x343   : > { %v2341_v11 = vpop.permute.xlu0 %2340 }
 0x344   : > { %v2343_v5 = vunpack.i.h.bf16 %v2341_v11  ;;  %v2342_v27 = vunpack.i.l.bf16 %v2341_v11  ;;  %v3428_v11 = vpop.permute.xlu1 %1175 }
 0x345   : > { %vm1212_vm14 = vcmp.gt.f32.partialorder %v2758_v53, %v3428_v11 }
 0x346   : > { %v1348_v8 = vsel %vm1204_vm0, 4.0, %v2343_v5  ;;  %v1408_v5 = vadd.s32 96, %v3370_v12  ;;  %v1347_v24 = vsel %vm1203_vm2, 4.0, %v2342_v27  ;;  %v1410_v27 = vadd.s32 112, %v3370_v12 }
 0x347   : > { %v1448_v17 = vsel %vm1432_vm1, %v1348_v8, 5.0  ;;  %v3452_v8 = vpop.eup %2423  ;;  %v1447_v33 = vsel %vm1431_vm3, %v1347_v24, 5.0  ;;  %v3481_v24 = vadd.s32 %v3382_v25, %v1409_v38 }
 0x348   : > { %4161 = vst [vmem:[#allocation35_spill] sm:$0xff] %v3452_v8  ;;  %v3464_v15 = vpop.eup %2425  ;;  %vm1464_vm8 = vcmp.eq.f32.partialorder %v1448_v17, 0.0  ;;  %v3471_v1 = vadd.s32 %v3382_v25, %v1408_v5  ;;  %vm1550_vm10 = vcmp.eq.f32.partialorder %v1448_v17, 1.0  ;;  %vm1635_vm4 = vcmp.eq.f32.partialorder %v1448_v17, 2.0 }
 0x349   : > { %4162 = vst [vmem:[#allocation36_spill] sm:$0xff] %v3464_v15  ;;  %v3473_v8 = vpop.eup %2427  ;;  %vm1720_vm11 = vcmp.eq.f32.partialorder %v1448_v17, 3.0  ;;  %v3484_v12 = vadd.s32 %v3382_v25, %v1410_v27  ;;  %v3493_v5 = vadd.s32 %v3382_v25, %v1411_v37  ;;  %vm1805_vm0 = vcmp.eq.f32.partialorder %v1448_v17, 4.0 }
 0x34a   : > { %4163 = vst [vmem:[#allocation37_spill] sm:$0xff] %v3473_v8  ;;  %v3475_v26 = vpop.eup %2429  ;;  %vm1463_vm1 = vcmp.eq.f32.partialorder %v1447_v33, 0.0  ;;  %vm1549_vm2 = vcmp.eq.f32.partialorder %v1447_v33, 1.0  ;;  %vm1634_vm3 = vcmp.eq.f32.partialorder %v1447_v33, 2.0  ;;  %vm1804_vm15 = vcmp.eq.f32.partialorder %v1447_v33, 4.0 }
 0x34b   : > { %4164 = vst [vmem:[#allocation38_spill] sm:$0xff] %v3475_v26  ;;  %v3495_v26 = vpop.eup %2431 }
 0x34c   : > { %4166 = vst [vmem:[#allocation39_spill] sm:$0xff] %v3495_v26  ;;  %v3503_v9 = vpop.eup %2433 }
 0x34d   : > { %4167 = vst [vmem:[#allocation40_spill] sm:$0xff] %v3503_v9 }
 0x34f   : > { %v2356_v10 = vpop.permute.xlu1 %2355  ;;  %v2346_v16 = vpop.permute.xlu0 %2345 }
 0x350   : > { %v2358_v21 = vunpack.i.h.bf16 %v2356_v10  ;;  %v2357_v52 = vunpack.i.l.bf16 %v2356_v10  ;;  %v4165_v10 = vmov 0.0   ;;  %v2348_v26 = vunpack.i.h.bf16 %v2346_v16 }
 0x351   : > { %v2043_v6 = vsel %vm1464_vm8, 1.0, %v4165_v10  ;;  %v2059_v38 = vsel %vm1550_vm10, 1.0, %v4165_v10  ;;  %v2075_v55 = vsel %vm1635_vm4, 1.0, %v4165_v10  ;;  %v2091_v27 = vsel %vm1720_vm11, 1.0, %v4165_v10 }
 0x352   : > { %v1353_v25 = vsel %vm1209_vm9, 4.0, %v2357_v52  ;;  %v1354_v37 = vsel %vm1210_vm13, 4.0, %v2358_v21  ;;  %vm1719_vm8 = vcmp.eq.f32.partialorder %v1447_v33, 3.0  ;;  %v3511_v15 = vsel %vm1509_vm5, %v2043_v6, 0.0 }
 0x353   : > { %v3514_v8 = vsel %vm1509_vm5, %v2059_v38, 0.0  ;;  %v2107_v9 = vsel %vm1805_vm0, 1.0, %v4165_v10  ;;  %v2042_v17 = vsel %vm1463_vm1, 1.0, %v4165_v10  ;;  %v3519_v46 = vsel %vm1509_vm5, %v2075_v55, 0.0 }
 0x354   : > { %v2058_v51 = vsel %vm1549_vm2, 1.0, %v4165_v10  ;;  %v1453_v36 = vsel %vm1437_vm6, %v1353_v25, 5.0  ;;  %v1454_v33 = vsel %vm1438_vm7, %v1354_v37, 5.0  ;;  %v2074_v21 = vsel %vm1634_vm3, 1.0, %v4165_v10 }
 0x355   : > { %v2090_v52 = vsel %vm1719_vm8, 1.0, %v4165_v10  ;;  %v2106_v6 = vsel %vm1804_vm15, 1.0, %v4165_v10  ;;  %v2347_v38 = vunpack.i.l.bf16 %v2346_v16  ;;  %v3530_v32 = vsel %vm1509_vm5, %v2091_v27, 0.0 }
 0x356   : > { %v3533_v55 = vsel %vm1509_vm5, %v2107_v9, 0.0  ;;  %v3536_v13 = vsel %vm1509_vm5, %v2042_v17, 0.0  ;;  %vm1439_vm6 = vcmp.lt.s32.totalorder %v3438_v0, 250  ;;  %v1356_v42 = vsel %vm1212_vm14, 4.0, %v2348_v26 }
 0x357   : > { %v3543_v43 = vsel %vm1509_vm5, %v2058_v51, 0.0  ;;  %vm1469_vm7 = vcmp.eq.f32.partialorder %v1453_v36, 0.0  ;;  %vm1470_vm10 = vcmp.eq.f32.partialorder %v1454_v33, 0.0  ;;  %vm1555_vm4 = vcmp.eq.f32.partialorder %v1453_v36, 1.0 }
 0x358   : > { %v3546_v16 = vsel %vm1509_vm5, %v2074_v21, 0.0  ;;  %v3549_v9 = vsel %vm1509_vm5, %v2090_v52, 0.0  ;;  %v3552_v27 = vsel %vm1509_vm5, %v2106_v6, 0.0  ;;  %vm1556_vm9 = vcmp.eq.f32.partialorder %v1454_v33, 1.0 }
 0x359   : > { %vm1201_vm14 = vcmp.gt.f32.partialorder %v2752_v50, %v3333_v41  ;;  %vm1202_vm15 = vcmp.gt.f32.partialorder %v2760_v54, %v3329_v20  ;;  %vm1640_vm0 = vcmp.eq.f32.partialorder %v1453_v36, 2.0  ;;  %vm1641_vm1 = vcmp.eq.f32.partialorder %v1454_v33, 2.0 }
 0x35a   : > { %v3562_v53 = vsel %vm1440_vm12, %v1356_v42, 5.0  ;;  %vm4168_vm2 = vcmp.gt.f32.partialorder %v2746_v49, %v3395_v4  ;;  %v2048_v11 = vsel %vm1469_vm7, 1.0, %v4165_v10  ;;  %v2049_v25 = vsel %vm1470_vm10, 1.0, %v4165_v10 }
 0x35b   : > { %v1355_v26 = vsel %vm4168_vm2, 4.0, %v2347_v38  ;;  %v2064_v37 = vsel %vm1555_vm4, 1.0, %v4165_v10  ;;  %vm1725_vm3 = vcmp.eq.f32.partialorder %v1453_v36, 3.0  ;;  %v2065_v17 = vsel %vm1556_vm9, 1.0, %v4165_v10 }
 0x35c   : > { %vm1726_vm8 = vcmp.eq.f32.partialorder %v1454_v33, 3.0  ;;  %vm1810_vm11 = vcmp.eq.f32.partialorder %v1453_v36, 4.0  ;;  %vm1811_vm13 = vcmp.eq.f32.partialorder %v1454_v33, 4.0  ;;  %v2080_v48 = vsel %vm1640_vm0, 1.0, %v4165_v10  ;;  %v2351_v33 = vpop.permute.xlu0 %2350 }
 0x35d   : > { %v2081_v51 = vsel %vm1641_vm1, 1.0, %v4165_v10  ;;  %vm1472_vm12 = vcmp.eq.f32.partialorder %v3562_v53, 0.0  ;;  %vm1558_vm2 = vcmp.eq.f32.partialorder %v3562_v53, 1.0  ;;  %v3576_v49 = vsel %vm1509_vm5, %v2048_v11, 0.0 }
 0x35e   : > { %v3579_v4 = vsel %vm1509_vm5, %v2049_v25, 0.0  ;;  %v3582_v21 = vsel %vm1509_vm5, %v2064_v37, 0.0  ;;  %v2096_v36 = vsel %vm1725_vm3, 1.0, %v4165_v10  ;;  %v3586_v52 = vsel %vm1509_vm5, %v2065_v17, 0.0 }
 0x35f   : > { %v2097_v6 = vsel %vm1726_vm8, 1.0, %v4165_v10  ;;  %v2112_v38 = vsel %vm1810_vm11, 1.0, %v4165_v10  ;;  %v2113_v42 = vsel %vm1811_vm13, 1.0, %v4165_v10  ;;  %v3592_v11 = vsel %vm1509_vm5, %v2080_v48, 0.0 }
 0x360   : > { %v3595_v25 = vsel %vm1509_vm5, %v2081_v51, 0.0  ;;  %v2051_v37 = vsel %vm1472_vm12, 1.0, %v4165_v10  ;;  %v2067_v30 = vsel %vm1558_vm2, 1.0, %v4165_v10  ;;  %v3600_v19 = vsel %vm1509_vm5, %v2096_v36, 0.0 }
 0x361   : > { %4169 = vst [vmem:[#allocation41_spill] sm:$0xff] %v3595_v25  ;;  %vm1643_vm7 = vcmp.eq.f32.partialorder %v3562_v53, 2.0  ;;  %v2353_v17 = vunpack.i.h.bf16 %v2351_v33  ;;  %v2352_v2 = vunpack.i.l.bf16 %v2351_v33  ;;  %v3604_v3 = vsel %vm1509_vm5, %v2097_v6, 0.0  ;;  %v3663_v25 = vpop.permute.xlu0 %1177 }
 0x362   : > { %4170 = vst [vmem:[#allocation42_spill] sm:$0xff] %v3604_v3  ;;  %v3607_v48 = vsel %vm1509_vm5, %v2112_v38, 0.0  ;;  %v3610_v51 = vsel %vm1509_vm5, %v2113_v42, 0.0  ;;  %v3614_v34 = vsel %vm1439_vm6, %v1355_v26, 5.0  ;;  %v3617_v36 = vsel %vm1509_vm5, %v2051_v37, 0.0 }
 0x363   : > { %4171 = vst [vmem:[#allocation43_spill] sm:$0xff] %v3610_v51  ;;  %v3620_v28 = vsel %vm1509_vm5, %v2067_v30, 0.0  ;;  %v1346_v33 = vsel %vm1202_vm15, 4.0, %v2353_v17  ;;  %v1345_v6 = vsel %vm1201_vm14, 4.0, %v2352_v2  ;;  %v2083_v38 = vsel %vm1643_vm7, 1.0, %v4165_v10 }
 0x364   : > { %vm1728_vm10 = vcmp.eq.f32.partialorder %v3562_v53, 3.0  ;;  %vm4172_vm6 = vcmp.lt.s32.totalorder %v3448_v31, 250  ;;  %vm4173_vm4 = vcmp.lt.s32.totalorder %v3445_v35, 250  ;;  %vm1813_vm15 = vcmp.eq.f32.partialorder %v3562_v53, 4.0 }
 0x365   : > { %v1446_v0 = vsel %vm4172_vm6, %v1346_v33, 5.0  ;;  %v1445_v26 = vsel %vm4173_vm4, %v1345_v6, 5.0  ;;  %vm1435_vm12 = vcmp.lt.s32.totalorder %v3455_v23, 250  ;;  %vm1436_vm2 = vcmp.lt.s32.totalorder %v3458_v40, 250 }
 0x366   : > { %vm1462_vm9 = vcmp.eq.f32.partialorder %v1446_v0, 0.0  ;;  %vm1548_vm11 = vcmp.eq.f32.partialorder %v1446_v0, 1.0  ;;  %vm1633_vm13 = vcmp.eq.f32.partialorder %v1446_v0, 2.0  ;;  %vm1718_vm0 = vcmp.eq.f32.partialorder %v1446_v0, 3.0 }
 0x367   : > { %v2041_v54 = vsel %vm1462_vm9, 1.0, %v4165_v10  ;;  %v2057_v50 = vsel %vm1548_vm11, 1.0, %v4165_v10  ;;  %v2073_v30 = vsel %vm1633_vm13, 1.0, %v4165_v10  ;;  %v2089_v2 = vsel %vm1718_vm0, 1.0, %v4165_v10 }
 0x368   : > { %v1511_v20 = vsel %vm1509_vm5, %v2041_v54, 0.0  ;;  %v1596_v31 = vsel %vm1509_vm5, %v2057_v50, 0.0  ;;  %v1681_v41 = vsel %vm1509_vm5, %v2073_v30, 0.0  ;;  %vm1803_vm14 = vcmp.eq.f32.partialorder %v1446_v0, 4.0 }
 0x369   : > { %vm1461_vm1 = vcmp.eq.f32.partialorder %v1445_v26, 0.0  ;;  %vm1547_vm3 = vcmp.eq.f32.partialorder %v1445_v26, 1.0  ;;  %vm1632_vm8 = vcmp.eq.f32.partialorder %v1445_v26, 2.0  ;;  %v2105_v35 = vsel %vm1803_vm14, 1.0, %v4165_v10 }
 0x36a   : > { %v2040_v42 = vsel %vm1461_vm1, 1.0, %v4165_v10  ;;  %v2056_v37 = vsel %vm1547_vm3, 1.0, %v4165_v10  ;;  %v2072_v17 = vsel %vm1632_vm8, 1.0, %v4165_v10  ;;  %v1766_v33 = vsel %vm1509_vm5, %v2089_v2, 0.0 }
 0x36b   : > { %v1510_v6 = vsel %vm1509_vm5, %v2040_v42, 0.0  ;;  %v1595_v54 = vsel %vm1509_vm5, %v2056_v37, 0.0  ;;  %v1680_v50 = vsel %vm1509_vm5, %v2072_v17, 0.0  ;;  %vm1207_vm7 = vcmp.gt.f32.partialorder %v2768_v56, %v3364_v45 }
 0x36c   : > { %vm1208_vm6 = vcmp.gt.f32.partialorder %v2780_v60, %v3375_v18  ;;  %v1512_v0 = vadd.f32 %v1511_v20, %v1510_v6  ;;  %v1597_v30 = vadd.f32 %v1596_v31, %v1595_v54  ;;  %v1682_v44 = vadd.f32 %v1681_v41, %v1680_v50 }
 0x36d   : > { %vm1717_vm4 = vcmp.eq.f32.partialorder %v1445_v26, 3.0  ;;  %vm1471_vm9 = vcmp.eq.f32.partialorder %v3614_v34, 0.0  ;;  %v1851_v2 = vsel %vm1509_vm5, %v2105_v35, 0.0  ;;  %vm1802_vm11 = vcmp.eq.f32.partialorder %v1445_v26, 4.0 }
 0x36e   : > { %v2088_v42 = vsel %vm1717_vm4, 1.0, %v4165_v10  ;;  %v1514_v37 = vadd.f32 %v3536_v13, %v1512_v0  ;;  %v1599_v17 = vadd.f32 %v3543_v43, %v1597_v30  ;;  %v1684_v51 = vadd.f32 %v3546_v16, %v1682_v44 }
 0x36f   : > { %v1765_v3 = vsel %vm1509_vm5, %v2088_v42, 0.0  ;;  %v2099_v20 = vsel %vm1728_vm10, 1.0, %v4165_v10  ;;  %v2115_v31 = vsel %vm1813_vm15, 1.0, %v4165_v10  ;;  %v2104_v26 = vsel %vm1802_vm11, 1.0, %v4165_v10 }
 0x370   : > { %v1767_v41 = vadd.f32 %v1766_v33, %v1765_v3  ;;  %v1850_v13 = vsel %vm1509_vm5, %v2104_v26, 0.0  ;;  %v3674_v43 = vadd.f32 %v3511_v15, %v1514_v37  ;;  %v3677_v44 = vadd.f32 %v3514_v8, %v1599_v17 }
 0x371   : > { %v3680_v16 = vadd.f32 %v3519_v46, %v1684_v51  ;;  %v2050_v35 = vsel %vm1471_vm9, 1.0, %v4165_v10  ;;  %vm1557_vm10 = vcmp.eq.f32.partialorder %v3614_v34, 1.0  ;;  %v1852_v53 = vadd.f32 %v1851_v2, %v1850_v13 }
 0x372   : > { %v1769_v3 = vadd.f32 %v3549_v9, %v1767_v41  ;;  %v3688_v33 = vsel %vm1509_vm5, %v2083_v38, 0.0  ;;  %vm1642_vm13 = vcmp.eq.f32.partialorder %v3614_v34, 2.0  ;;  %vm1727_vm0 = vcmp.eq.f32.partialorder %v3614_v34, 3.0 }
 0x373   : > { %vm1812_vm15 = vcmp.eq.f32.partialorder %v3614_v34, 4.0  ;;  %v2361_v46 = vpop.permute.xlu0 %2360  ;;  %v1854_v15 = vadd.f32 %v3552_v27, %v1852_v53  ;;  %v3698_v9 = vsel %vm1509_vm5, %v2099_v20, 0.0  ;;  %v3701_v38 = vsel %vm1509_vm5, %v2115_v31, 0.0 }
 0x374   : > { %v2363_v8 = vunpack.i.h.bf16 %v2361_v46  ;;  %v2362_v51 = vunpack.i.l.bf16 %v2361_v46  ;;  %v3695_v6 = vadd.f32 %v3530_v32, %v1769_v3  ;;  %v3704_v54 = vsel %vm1509_vm5, %v2050_v35, 0.0 }
 0x375   : > { %v2066_v50 = vsel %vm1557_vm10, 1.0, %v4165_v10  ;;  %v2082_v0 = vsel %vm1642_vm13, 1.0, %v4165_v10  ;;  %vm1433_vm14 = vcmp.lt.s32.totalorder %v3461_v14, 250  ;;  %vm1434_vm1 = vcmp.lt.s32.totalorder %v3468_v47, 250 }
 0x376   : > { %v1352_v27 = vsel %vm1208_vm6, 4.0, %v2363_v8  ;;  %v1351_v32 = vsel %vm1207_vm7, 4.0, %v2362_v51  ;;  %v3717_v30 = vadd.f32 %v3533_v55, %v1854_v15  ;;  %vm1205_vm3 = vcmp.gt.f32.partialorder %v2776_v58, %v3339_v29 }
 0x377   : > { %vm1206_vm8 = vcmp.gt.f32.partialorder %v2784_v62, %v3349_v7  ;;  %v2098_v60 = vsel %vm1727_vm0, 1.0, %v4165_v10  ;;  %v2114_v56 = vsel %vm1812_vm15, 1.0, %v4165_v10  ;;  %v1452_v45 = vsel %vm1436_vm2, %v1352_v27, 5.0  ;;  %v2366_v55 = vpop.permute.xlu1 %2365 }
 0x378   : > { %v1451_v18 = vsel %vm1435_vm12, %v1351_v32, 5.0  ;;  %vm1468_vm7 = vcmp.eq.f32.partialorder %v1452_v45, 0.0  ;;  %vm1554_vm6 = vcmp.eq.f32.partialorder %v1452_v45, 1.0  ;;  %vm1639_vm4 = vcmp.eq.f32.partialorder %v1452_v45, 2.0 }
 0x379   : > { %vm1724_vm9 = vcmp.eq.f32.partialorder %v1452_v45, 3.0  ;;  %v3734_v2 = vsel %vm1509_vm5, %v2066_v50, 0.0  ;;  %v3737_v42 = vsel %vm1509_vm5, %v2082_v0, 0.0  ;;  %v2047_v34 = vsel %vm1468_vm7, 1.0, %v4165_v10 }
 0x37a   : > { %v2063_v37 = vsel %vm1554_vm6, 1.0, %v4165_v10  ;;  %v3742_v40 = vsel %vm1509_vm5, %v2098_v60, 0.0  ;;  %v3745_v23 = vsel %vm1509_vm5, %v2114_v56, 0.0  ;;  %v2079_v17 = vsel %vm1639_vm4, 1.0, %v4165_v10 }
 0x37b   : > { %v2095_v20 = vsel %vm1724_vm9, 1.0, %v4165_v10  ;;  %vm1809_vm12 = vcmp.eq.f32.partialorder %v1452_v45, 4.0  ;;  %vm1467_vm2 = vcmp.eq.f32.partialorder %v1451_v18, 0.0  ;;  %vm1553_vm11 = vcmp.eq.f32.partialorder %v1451_v18, 1.0 }
 0x37c   : > { %vm1638_vm10 = vcmp.eq.f32.partialorder %v1451_v18, 2.0  ;;  %v3750_v31 = vsel %vm1509_vm5, %v2047_v34, 0.0  ;;  %v3753_v41 = vsel %vm1509_vm5, %v2063_v37, 0.0  ;;  %v2111_v26 = vsel %vm1809_vm12, 1.0, %v4165_v10  ;;  %v3757_v35 = vpop.permute.xlu1 %1181 }
 0x37d   : > { %v2046_v13 = vsel %vm1467_vm2, 1.0, %v4165_v10  ;;  %v3760_v3 = vsel %vm1509_vm5, %v2079_v17, 0.0  ;;  %v3763_v53 = vsel %vm1509_vm5, %v2095_v20, 0.0  ;;  %v2062_v46 = vsel %vm1553_vm11, 1.0, %v4165_v10 }
 0x37e   : > { %v2078_v15 = vsel %vm1638_vm10, 1.0, %v4165_v10  ;;  %vm1723_vm13 = vcmp.eq.f32.partialorder %v1451_v18, 3.0  ;;  %vm1808_vm0 = vcmp.eq.f32.partialorder %v1451_v18, 4.0  ;;  %v2368_v8 = vunpack.i.h.bf16 %v2366_v55 }
 0x37f   : > { %v2367_v51 = vunpack.i.l.bf16 %v2366_v55  ;;  %v3768_v50 = vsel %vm1509_vm5, %v2111_v26, 0.0  ;;  %v1521_v0 = vsel %vm1509_vm5, %v2046_v13, 0.0  ;;  %v2094_v27 = vsel %vm1723_vm13, 1.0, %v4165_v10  ;;  %v1180_v26 = vpop.permute.xlu0 %1179 }
 0x380   : > { %v2110_v32 = vsel %vm1808_vm0, 1.0, %v4165_v10  ;;  %v1606_v60 = vsel %vm1509_vm5, %v2062_v46, 0.0  ;;  %v1691_v56 = vsel %vm1509_vm5, %v2078_v15, 0.0  ;;  %v1350_v18 = vsel %vm1206_vm8, 4.0, %v2368_v8  ;;  %v3781_v55 = vpop.permute.xlu1 %1183 }
 0x381   : > { %v1349_v45 = vsel %vm1205_vm3, 4.0, %v2367_v51  ;;  %v3785_v34 = vsel %vm1509_vm5, %v2094_v27, 0.0  ;;  %v3788_v37 = vsel %vm1509_vm5, %v2110_v32, 0.0  ;;  %v1450_v58 = vsel %vm1434_vm1, %v1350_v18, 5.0 }
 0x382   : > { %v1449_v17 = vsel %vm1433_vm14, %v1349_v45, 5.0  ;;  %vm1466_vm3 = vcmp.eq.f32.partialorder %v1450_v58, 0.0  ;;  %vm1552_vm8 = vcmp.eq.f32.partialorder %v1450_v58, 1.0  ;;  %vm1637_vm1 = vcmp.eq.f32.partialorder %v1450_v58, 2.0 }
 0x383   : > { %vm1465_vm15 = vcmp.eq.f32.partialorder %v1449_v17, 0.0  ;;  %vm1551_vm7 = vcmp.eq.f32.partialorder %v1449_v17, 1.0  ;;  %v2045_v29 = vsel %vm1466_vm3, 1.0, %v4165_v10  ;;  %v2061_v20 = vsel %vm1552_vm8, 1.0, %v4165_v10 }
 0x384   : > { %v2044_v62 = vsel %vm1465_vm15, 1.0, %v4165_v10  ;;  %v2060_v7 = vsel %vm1551_vm7, 1.0, %v4165_v10  ;;  %v1519_v14 = vsel %vm1509_vm5, %v2045_v29, 0.0  ;;  %v1604_v46 = vsel %vm1509_vm5, %v2061_v20, 0.0  ;;  %v1220_v15 = vpop.permute.xlu1 %1219 }
 0x385   : > { %v1517_v47 = vsel %vm1509_vm5, %v2044_v62, 0.0  ;;  %v1602_v13 = vsel %vm1509_vm5, %v2060_v7, 0.0  ;;  %vm1636_vm14 = vcmp.eq.f32.partialorder %v1449_v17, 2.0  ;;  %v2077_v32 = vsel %vm1637_vm1, 1.0, %v4165_v10 }
 0x386   : > { %v1518_v8 = vadd.f32 %v1517_v47, %v3674_v43  ;;  %v1603_v51 = vadd.f32 %v1602_v13, %v3677_v44  ;;  %v2076_v27 = vsel %vm1636_vm14, 1.0, %v4165_v10  ;;  %vm1721_vm6 = vcmp.eq.f32.partialorder %v1449_v17, 3.0 }
 0x387   : > { %vm1722_vm4 = vcmp.eq.f32.partialorder %v1450_v58, 3.0  ;;  %vm1214_vm9 = vcmp.gt.f32.partialorder %v2786_v63, %v1180_v26  ;;  %vm1377_vm12 = vcmask 64512   ;;  %vm1441_vm2 = vcmp.lt.s32.totalorder %v3471_v1, 250 }
 0x388   : > { %vm1442_vm11 = vcmp.lt.s32.totalorder %v3481_v24, 250  ;;  %vm1213_vm10 = vcmp.gt.f32.partialorder %v2778_v59, %v3663_v25  ;;  %v1520_v43 = vadd.f32 %v1519_v14, %v1518_v8  ;;  %v1605_v44 = vadd.f32 %v1604_v46, %v1603_v51 }
 0x389   : > { %v1687_v45 = vsel %vm1509_vm5, %v2076_v27, 0.0  ;;  %v1689_v18 = vsel %vm1509_vm5, %v2077_v32, 0.0  ;;  %v2092_v29 = vsel %vm1721_vm6, 1.0, %v4165_v10  ;;  %v2093_v7 = vsel %vm1722_vm4, 1.0, %v4165_v10  ;;  %v2376_v27 = vpop.permute.xlu1 %2375 }
 0x38a   : > { %v1688_v62 = vadd.f32 %v1687_v45, %v3680_v16  ;;  %vm1806_vm13 = vcmp.eq.f32.partialorder %v1449_v17, 4.0  ;;  %v1522_v20 = vadd.f32 %v1521_v0, %v1520_v43  ;;  %v1607_v47 = vadd.f32 %v1606_v60, %v1605_v44  ;;  %v3832_v16 = vpop.permute.xlu0 %2370 }
 0x38b   : > { %v1772_v14 = vsel %vm1509_vm5, %v2092_v29, 0.0  ;;  %v1774_v13 = vsel %vm1509_vm5, %v2093_v7, 0.0  ;;  %vm1807_vm0 = vcmp.eq.f32.partialorder %v1450_v58, 4.0  ;;  %v2108_v51 = vsel %vm1806_vm13, 1.0, %v4165_v10 }
 0x38c   : > { %v1690_v46 = vadd.f32 %v1689_v18, %v1688_v62  ;;  %v1773_v8 = vadd.f32 %v1772_v14, %v3695_v6  ;;  %v1524_v32 = vadd.f32 %v3750_v31, %v1522_v20  ;;  %v1609_v45 = vadd.f32 %v3753_v41, %v1607_v47 }
 0x38d   : > { %v2109_v0 = vsel %vm1807_vm0, 1.0, %v4165_v10  ;;  %v1857_v60 = vsel %vm1509_vm5, %v2108_v51, 0.0  ;;  %v1266_v62 = vmax.f32 %v3202_v39, %v1220_v15  ;;  %v2378_v31 = vunpack.i.h.bf16 %v2376_v27  ;;  %v3864_v14 = vpop.permute.xlu1 %1223 }
 0x38e   : > { %v1692_v17 = vadd.f32 %v1691_v56, %v1690_v46  ;;  %v1775_v43 = vadd.f32 %v1774_v13, %v1773_v8  ;;  %v1858_v44 = vadd.f32 %v1857_v60, %v3717_v30  ;;  %v1859_v6 = vsel %vm1509_vm5, %v2109_v0, 0.0  ;;  %v3851_v56 = vpop.permute.xlu0 %1217 }
 0x38f   : > { %v1526_v58 = vadd.f32 %v3576_v49, %v1524_v32  ;;  %v1611_v18 = vadd.f32 %v3582_v21, %v1609_v45  ;;  %v2377_v30 = vunpack.i.l.bf16 %v2376_v27  ;;  %v1362_v49 = vmul.f32 %v3398_v22, %v1266_v62  ;;  %v4175_v32 = vld [vmem:[#allocation41_spill] sm:$0xff] }
 0x390   : > { %v1694_v41 = vadd.f32 %v3760_v3, %v1692_v17  ;;  %v1777_v29 = vadd.f32 %v3785_v34, %v1775_v43  ;;  %v1860_v7 = vadd.f32 %v1859_v6, %v1858_v44  ;;  %v1358_v39 = vsel %vm1214_vm9, 4.0, %v2378_v31  ;;  %v4176_v6 = vld [vmem:[#allocation42_spill] sm:$0xff] }
 0x391   : > { %v1528_v21 = vadd.f32 %v3579_v4, %v1526_v58  ;;  %v1613_v3 = vadd.f32 %v3586_v52, %v1611_v18  ;;  %v1357_v47 = vsel %vm1213_vm10, 4.0, %v2377_v30  ;;  %1379 = vst.msk [vmem:[%s3849_s8 + $0x8] sm:$0xff] %vm1377_vm12, %v1362_v49  ;;  %v1458_v22 = vsel %vm1442_vm11, %v1358_v39, 5.0  ;;  %v3895_v46 = vpop.permute.xlu1 %1227  ;;  %v4177_v39 = vld [vmem:[#allocation43_spill] sm:$0xff] }
 0x392   : > { %v1696_v34 = vadd.f32 %v3592_v11, %v1694_v41  ;;  %v1779_v15 = vadd.f32 %v3763_v53, %v1777_v29  ;;  %v1862_v20 = vadd.f32 %v3788_v37, %v1860_v7  ;;  %v1457_v63 = vsel %vm1441_vm2, %v1357_v47, 5.0  ;;  %v3876_v59 = vpop.permute.xlu0 %1221 }
 0x393   : > { %v1530_v4 = vadd.f32 %v3704_v54, %v1528_v21  ;;  %v1615_v52 = vadd.f32 %v3734_v2, %v1613_v3  ;;  %vm1473_vm15 = vcmp.eq.f32.partialorder %v1457_v63, 0.0  ;;  %vm1474_vm3 = vcmp.eq.f32.partialorder %v1458_v22, 0.0 }
 0x394   : > { %v1781_v11 = vadd.f32 %v3600_v19, %v1779_v15  ;;  %v1864_v53 = vadd.f32 %v3768_v50, %v1862_v20  ;;  %v2052_v25 = vsel %vm1473_vm15, 1.0, %v4165_v10  ;;  %v2053_v1 = vsel %vm1474_vm3, 1.0, %v4165_v10 }
 0x395   : > { %v1532_v37 = vadd.f32 %v3617_v36, %v1530_v4  ;;  %vm1559_vm7 = vcmp.eq.f32.partialorder %v1457_v63, 1.0  ;;  %v1533_v54 = vsel %vm1509_vm5, %v2052_v25, 0.0  ;;  %v1535_v2 = vsel %vm1509_vm5, %v2053_v1, 0.0  ;;  %v3920_v3 = vpop.permute.xlu1 %1231  ;;  %v4179_v4 = vld [vmem:[#allocation20_spill] sm:$0xff]  ;;  %v4180_v25 = vld [vmem:[#allocation23_spill] sm:$0xff] }
 0x396   : > { %v1866_v24 = vadd.f32 %v3607_v48, %v1864_v53  ;;  %vm1560_vm8 = vcmp.eq.f32.partialorder %v1458_v22, 1.0  ;;  %v2068_v50 = vsel %vm1559_vm7, 1.0, %v4165_v10  ;;  %v1617_v13 = vadd.f32 %v3620_v28, %v1615_v52  ;;  %v3904_v17 = vpop.permute.xlu0 %1225 }
 0x397   : > { %v1534_v19 = vadd.f32 %v1533_v54, %v1532_v37  ;;  %v2069_v26 = vsel %vm1560_vm8, 1.0, %v4165_v10  ;;  %vm1443_vm14 = vcmp.lt.s32.totalorder %v3484_v12, 250  ;;  %vm1444_vm1 = vcmp.lt.s32.totalorder %v3493_v5, 250 }
 0x398   : > { %vm1215_vm6 = vcmp.gt.f32.partialorder %v2770_v57, %v3757_v35  ;;  %vm1216_vm4 = vcmp.gt.f32.partialorder %v2782_v61, %v3781_v55  ;;  %v1618_v48 = vsel %vm1509_vm5, %v2068_v50, 0.0  ;;  %v1620_v36 = vsel %vm1509_vm5, %v2069_v26, 0.0 }
 0x399   : > { %vm1644_vm9 = vcmp.eq.f32.partialorder %v1457_v63, 2.0  ;;  %vm1645_vm2 = vcmp.eq.f32.partialorder %v1458_v22, 2.0  ;;  %v3897_v8 = vadd.f32 %v1535_v2, %v1534_v19  ;;  %v1619_v28 = vadd.f32 %v1618_v48, %v1617_v13  ;;  %v3949_v54 = vpop.permute.xlu1 %1235 }
 0x39a   : > { %v2084_v51 = vsel %vm1644_vm9, 1.0, %v4165_v10  ;;  %v2085_v27 = vsel %vm1645_vm2, 1.0, %v4165_v10  ;;  %v1698_v45 = vadd.f32 %v4175_v32, %v1696_v34  ;;  %vm1729_vm11 = vcmp.eq.f32.partialorder %v1457_v63, 3.0 }
 0x39b   : > { %v1703_v0 = vsel %vm1509_vm5, %v2084_v51, 0.0  ;;  %v1705_v60 = vsel %vm1509_vm5, %v2085_v27, 0.0  ;;  %v3906_v43 = vadd.f32 %v1620_v36, %v1619_v28  ;;  %vm1730_vm10 = vcmp.eq.f32.partialorder %v1458_v22, 3.0 }
 0x39c   : > { %v2100_v44 = vsel %vm1729_vm11, 1.0, %v4165_v10  ;;  %v1783_v58 = vadd.f32 %v4176_v6, %v1781_v11  ;;  %v1700_v18 = vadd.f32 %v3737_v42, %v1698_v45  ;;  %v2101_v62 = vsel %vm1730_vm10, 1.0, %v4165_v10  ;;  %v3931_v11 = vpop.permute.xlu0 %1229 }
 0x39d   : > { %v1788_v31 = vsel %vm1509_vm5, %v2100_v44, 0.0  ;;  %vm1814_vm13 = vcmp.eq.f32.partialorder %v1457_v63, 4.0  ;;  %v1790_v29 = vsel %vm1509_vm5, %v2101_v62, 0.0  ;;  %vm1815_vm0 = vcmp.eq.f32.partialorder %v1458_v22, 4.0  ;;  %v3969_v44 = vpop.permute.xlu1 %1239 }
 0x39e   : > { %v1785_v41 = vadd.f32 %v3742_v40, %v1783_v58  ;;  %v2116_v7 = vsel %vm1814_vm13, 1.0, %v4165_v10  ;;  %v1702_v30 = vadd.f32 %v3688_v33, %v1700_v18  ;;  %v2117_v49 = vsel %vm1815_vm0, 1.0, %v4165_v10  ;;  %v4178_v33 = vld [vmem:[#allocation24_spill] sm:$0xff] }
 0x39f   : > { %v1868_v21 = vadd.f32 %v4177_v39, %v1866_v24  ;;  %v1873_v42 = vsel %vm1509_vm5, %v2116_v7, 0.0  ;;  %v1875_v15 = vsel %vm1509_vm5, %v2117_v49, 0.0  ;;  %v2373_v40 = vunpack.i.h.bf16 %v3832_v16 }
 0x3a0   : > { %v1787_v34 = vadd.f32 %v3698_v9, %v1785_v41  ;;  %v2372_v20 = vunpack.i.l.bf16 %v3832_v16  ;;  %v1704_v47 = vadd.f32 %v1703_v0, %v1702_v30  ;;  %v1268_v22 = vmax.f32 %v4178_v33, %v3864_v14  ;;  %v3955_v50 = vpop.permute.xlu0 %1233 }
 0x3a1   : > { %v1870_v63 = vadd.f32 %v3745_v23, %v1868_v21  ;;  %v1265_v52 = vmax.f32 %v4179_v4, %v3851_v56  ;;  %v1360_v9 = vsel %vm1216_vm4, 4.0, %v2373_v40  ;;  %v1270_v23 = vmax.f32 %v4180_v25, %v3895_v46  ;;  %v4182_v21 = vld [vmem:[#allocation12_spill] sm:$0xff] }
 0x3a2   : > { %v1789_v53 = vadd.f32 %v1788_v31, %v1787_v34  ;;  %v1359_v16 = vsel %vm1215_vm6, 4.0, %v2372_v20  ;;  %v1706_v1 = vadd.f32 %v1705_v60, %v1704_v47  ;;  %v1460_v56 = vsel %vm1444_vm1, %v1360_v9, 5.0  ;;  %v4184_v20 = vld [vmem:[#allocation22_spill] sm:$0xff]  ;;  %v4185_v4 = vld [vmem:[#allocation28_spill] sm:$0xff] }
 0x3a3   : > { %v1872_v14 = vadd.f32 %v3701_v38, %v1870_v63  ;;  %v1459_v37 = vsel %vm1443_vm14, %v1359_v16, 5.0  ;;  %vm1476_vm15 = vcmp.eq.f32.partialorder %v1460_v56, 0.0  ;;  %vm1562_vm3 = vcmp.eq.f32.partialorder %v1460_v56, 1.0  ;;  %v4186_v16 = vld [vmem:[#allocation11_spill] sm:$0xff] }
 0x3a4   : > { %v1791_v24 = vadd.f32 %v1790_v29, %v1789_v53  ;;  %vm1647_vm7 = vcmp.eq.f32.partialorder %v1460_v56, 2.0  ;;  %v2055_v57 = vsel %vm1476_vm15, 1.0, %v4165_v10  ;;  %v2071_v35 = vsel %vm1562_vm3, 1.0, %v4165_v10  ;;  %v4181_v29 = vld [vmem:[#allocation13_spill] sm:$0xff]  ;;  %v3975_v7 = vpop.permute.xlu0 %1237 }
 0x3a5   : > { %v1874_v61 = vadd.f32 %v1873_v42, %v1872_v14  ;;  %v2087_v55 = vsel %vm1647_vm7, 1.0, %v4165_v10  ;;  %v1539_v38 = vsel %vm1509_vm5, %v2055_v57, 0.0  ;;  %v1624_v5 = vsel %vm1509_vm5, %v2071_v35, 0.0  ;;  %v4189_v35 = vld [vmem:[#allocation15_spill] sm:$0xff] }
 0x3a6   : > { %v1709_v12 = vsel %vm1509_vm5, %v2087_v55, 0.0  ;;  %vm1732_vm8 = vcmp.eq.f32.partialorder %v1460_v56, 3.0  ;;  %vm1817_vm14 = vcmp.eq.f32.partialorder %v1460_v56, 4.0  ;;  %vm1475_vm1 = vcmp.eq.f32.partialorder %v1459_v37, 0.0 }
 0x3a7   : > { %v1876_v2 = vadd.f32 %v1875_v15, %v1874_v61  ;;  %v2103_v19 = vsel %vm1732_vm8, 1.0, %v4165_v10  ;;  %v2119_v13 = vsel %vm1817_vm14, 1.0, %v4165_v10  ;;  %v2054_v48 = vsel %vm1475_vm1, 1.0, %v4165_v10 }
 0x3a8   : > { %v1794_v26 = vsel %vm1509_vm5, %v2103_v19, 0.0  ;;  %vm1561_vm6 = vcmp.eq.f32.partialorder %v1459_v37, 1.0  ;;  %v1879_v36 = vsel %vm1509_vm5, %v2119_v13, 0.0  ;;  %v1537_v46 = vsel %vm1509_vm5, %v2054_v48, 0.0 }
 0x3a9   : > { %v2070_v28 = vsel %vm1561_vm6, 1.0, %v4165_v10  ;;  %vm1646_vm4 = vcmp.eq.f32.partialorder %v1459_v37, 2.0  ;;  %v1538_v51 = vadd.f32 %v1537_v46, %v3897_v8  ;;  %vm1731_vm9 = vcmp.eq.f32.partialorder %v1459_v37, 3.0  ;;  %v4192_v46 = vld [vmem:[#allocation18_spill] sm:$0xff] }
 0x3aa   : > { %v1622_v27 = vsel %vm1509_vm5, %v2070_v28, 0.0  ;;  %v2086_v32 = vsel %vm1646_vm4, 1.0, %v4165_v10  ;;  %v2102_v60 = vsel %vm1731_vm9, 1.0, %v4165_v10  ;;  %vm1816_vm2 = vcmp.eq.f32.partialorder %v1459_v37, 4.0 }
 0x3ab   : > { %v1623_v45 = vadd.f32 %v1622_v27, %v3906_v43  ;;  %v1707_v0 = vsel %vm1509_vm5, %v2086_v32, 0.0  ;;  %v1540_v6 = vadd.f32 %v1539_v38, %v1538_v51  ;;  %v1792_v18 = vsel %vm1509_vm5, %v2102_v60, 0.0  ;;  %v4190_v38 = vld [vmem:[#allocation27_spill] sm:$0xff] }
 0x3ac   : > { %v1708_v58 = vadd.f32 %v1707_v0, %v1706_v1  ;;  %v2118_v8 = vsel %vm1816_vm2, 1.0, %v4165_v10  ;;  %v1793_v31 = vadd.f32 %v1792_v18, %v1791_v24  ;;  %v1364_v43 = vmul.f32 %v4181_v29, %v1268_v22  ;;  %v4183_v10 = vld [vmem:[#allocation14_spill] sm:$0xff]  ;;  %v1244_v1 = vpop.permute.xlu1 %1243  ;;  %v4188_v24 = vld [vmem:[#allocation16_spill] sm:$0xff]  ;;  %v4194_v0 = vld [vmem:[#allocation17_spill] sm:$0xff] }
 0x3ad   : > { %v1625_v62 = vadd.f32 %v1624_v5, %v1623_v45  ;;  %v1877_v41 = vsel %vm1509_vm5, %v2118_v8, 0.0  ;;  %v1541_v30 = vrot.slane %v1540_v6, 4  ;;  %v1361_v42 = vmul.f32 %v4182_v21, %v1265_v52  ;;  %v4196_v8 = vld [vmem:[#allocation25_spill] sm:$0xff]  ;;  %v4198_v21 = vld [vmem:[#allocation19_spill] sm:$0xff] }
 0x3ae   : > { %v1710_v49 = vadd.f32 %v1709_v12, %v1708_v58  ;;  %v1878_v39 = vadd.f32 %v1877_v41, %v1876_v2  ;;  %v1795_v15 = vadd.f32 %v1794_v26, %v1793_v31  ;;  %1381 = vst.msk [vmem:[%s3849_s8 + $0x18] sm:$0xff] %vm1377_vm12, %v1364_v43  ;;  %v1366_v40 = vmul.f32 %v4183_v10, %v1270_v23  ;;  %v4187_v23 = vld [vmem:[#allocation21_spill] sm:$0xff]  ;;  %v4191_v26 = vld [vmem:[#allocation26_spill] sm:$0xff]  ;;  %v4197_v43 = vld [vmem:[#allocation32_spill] sm:$0xff] }
 0x3af   : > { %v1626_v34 = vrot.slane %v1625_v62, 4  ;;  %v1267_v47 = vmax.f32 %v4184_v20, %v3876_v59  ;;  %vm1887_vm5 = vcmask 1040384   ;;  %v1542_v63 = vadd.f32 %v1541_v30, %v1540_v6  ;;  %1378 = vst.msk [vmem:[%s3849_s8] sm:$0xff] %vm1377_vm12, %v1361_v42  ;;  %v4200_v20 = vld [vmem:[#allocation37_spill] sm:$0xff] }
 0x3b0   : > { %v1711_v33 = vrot.slane %v1710_v49, 4  ;;  %v1880_v22 = vadd.f32 %v1879_v36, %v1878_v39  ;;  %v1272_v53 = vmax.f32 %v4185_v4, %v3920_v3  ;;  %vm1889_vm11 = vcmask 1041408   ;;  %1383 = vst.msk [vmem:[%s3849_s8 + $0x28] sm:$0xff] %vm1377_vm12, %v1366_v40  ;;  %v1248_v31 = vpop.permute.xlu1 %1247 }
 0x3b1   : > { %v1627_v52 = vadd.f32 %v1626_v34, %v1625_v62  ;;  %v1796_v9 = vrot.slane %v1795_v15, 4  ;;  %v1363_v25 = vmul.f32 %v4186_v16, %v1267_v47  ;;  %v1269_v59 = vmax.f32 %v4187_v23, %v3904_v17  ;;  %v1242_v17 = vpop.permute.xlu0 %1241  ;;  %v4199_v34 = vld [vmem:[#allocation29_spill] sm:$0xff]  ;;  %v4204_v23 = vld [vmem:[#allocation39_spill] sm:$0xff] }
 0x3b2   : > { %vm1891_vm10 = vcmask 1042432   ;;  %v1543_v14 = vrot.slane %v1542_v63, 2  ;;  %v1712_v56 = vadd.f32 %v1711_v33, %v1710_v49  ;;  %v1881_v37 = vrot.slane %v1880_v22, 4 }
 0x3b3   : > { %v1368_v61 = vmul.f32 %v4188_v24, %v1272_v53  ;;  %vm1893_vm13 = vcmask 1043456   ;;  %v1628_v3 = vrot.slane %v1627_v52, 2  ;;  %v1797_v57 = vadd.f32 %v1796_v9, %v1795_v15  ;;  %1380 = vst.msk [vmem:[%s3849_s8 + $0x10] sm:$0xff] %vm1377_vm12, %v1363_v25  ;;  %v4202_v53 = vld [vmem:[#allocation36_spill] sm:$0xff]  ;;  %v4203_v9 = vld [vmem:[#allocation31_spill] sm:$0xff] }
 0x3b4   : > { %v1365_v55 = vmul.f32 %v4189_v35, %v1269_v59  ;;  %v1274_v5 = vmax.f32 %v4190_v38, %v3949_v54  ;;  %vm1895_vm0 = vcmask 1044480   ;;  %v1544_v12 = vadd.f32 %v1543_v14, %v1542_v63  ;;  %v4193_v54 = vld [vmem:[#allocation30_spill] sm:$0xff] }
 0x3b5   : > { %v1713_v2 = vrot.slane %v1712_v56, 2  ;;  %v1882_v19 = vadd.f32 %v1881_v37, %v1880_v22  ;;  %1385 = vst.msk [vmem:[%s3849_s8 + $0x38] sm:$0xff] %vm1377_vm12, %v1368_v61  ;;  %v1271_v13 = vmax.f32 %v4191_v26, %v3931_v11  ;;  %v1629_v48 = vadd.f32 %v1628_v3, %v1627_v52  ;;  %v4195_v11 = vld [vmem:[#allocation35_spill] sm:$0xff]  ;;  %v4201_v63 = vld [vmem:[#allocation34_spill] sm:$0xff]  ;;  %v4207_v3 = vld [vmem:[#allocation40_spill] sm:$0xff] }
 0x3b6   : > { %v1798_v36 = vrot.slane %v1797_v57, 2  ;;  %1382 = vst.msk [vmem:[%s3849_s8 + $0x20] sm:$0xff] %vm1377_vm12, %v1365_v55  ;;  %v1370_v28 = vmul.f32 %v4192_v46, %v1274_v5  ;;  %v1276_v51 = vmax.f32 %v4193_v54, %v3969_v44  ;;  %v1545_v27 = vrot.slane %v1544_v12, 1  ;;  %v4206_v37 = vld [vmem:[#allocation38_spill] sm:$0xff] }
 0x3b7   : > { %v1714_v32 = vadd.f32 %v1713_v2, %v1712_v56  ;;  %v1883_v45 = vrot.slane %v1882_v19, 2  ;;  %v1367_v60 = vmul.f32 %v4194_v0, %v1271_v13  ;;  %v1630_v6 = vrot.slane %v1629_v48, 1 }
 0x3b8   : > { %v1799_v58 = vadd.f32 %v1798_v36, %v1797_v57  ;;  %1387 = vst.msk [vmem:[%s3849_s8 + $0x48] sm:$0xff] %vm1377_vm12, %v1370_v28  ;;  %v1372_v18 = vmul.f32 %v4195_v11, %v1276_v51  ;;  %v1273_v62 = vmax.f32 %v4196_v8, %v3955_v50  ;;  %v1546_v41 = vadd.f32 %v1545_v27, %v1544_v12  ;;  %v1246_v50 = vpop.permute.xlu0 %1245 }
 0x3b9   : > { %v1715_v29 = vrot.slane %v1714_v32, 1  ;;  %v1884_v44 = vadd.f32 %v1883_v45, %v1882_v19  ;;  %1384 = vst.msk [vmem:[%s3849_s8 + $0x30] sm:$0xff] %vm1377_vm12, %v1367_v60  ;;  %v1278_v30 = vmax.f32 %v4197_v43, %v1244_v1  ;;  %v1631_v49 = vadd.f32 %v1630_v6, %v1629_v48  ;;  %v4205_v1 = vld [vmem:[#allocation33_spill] sm:$0xff] }
 0x3ba   : > { %v1800_v39 = vrot.slane %v1799_v58, 1  ;;  %1389 = vst.msk [vmem:[%s3849_s8 + $0x58] sm:$0xff] %vm1377_vm12, %v1372_v18  ;;  %v1369_v42 = vmul.f32 %v4198_v21, %v1273_v62  ;;  %v1275_v15 = vmax.f32 %v4199_v34, %v3975_v7  ;;  %v1280_v33 = vmax.f32 %v4201_v63, %v1248_v31 }
 0x3bb   : > { %v1716_v10 = vadd.f32 %v1715_v29, %v1714_v32  ;;  %v1885_v40 = vrot.slane %v1884_v44, 1  ;;  %v1374_v47 = vmul.f32 %v4200_v20, %v1278_v30  ;;  %v1888_v4 = vsel %vm1887_vm5, %v1546_v41, %v1631_v49  ;;  %1900 = sbr.rel (%p4208_p1) target bundleno = 962 (0x3c2), region = 40 }
 0x3bc   : > { %v1801_v22 = vadd.f32 %v1800_v39, %v1799_v58  ;;  %1386 = vst.msk [vmem:[%s3849_s8 + $0x40] sm:$0xff] %vm1377_vm12, %v1369_v42  ;;  %v1371_v52 = vmul.f32 %v4202_v53, %v1275_v15  ;;  %v1277_v7 = vmax.f32 %v4203_v9, %v1242_v17  ;;  %v1376_v59 = vmul.f32 %v4204_v23, %v1280_v33 }
 0x3bd   : > { %v1886_v16 = vadd.f32 %v1885_v40, %v1884_v44  ;;  %v1890_v25 = vsel %vm1889_vm11, %v1888_v4, %v1716_v10  ;;  %1391 = vst.msk [vmem:[%s3849_s8 + $0x68] sm:$0xff] %vm1377_vm12, %v1374_v47  ;;  %v1279_v14 = vmax.f32 %v4205_v1, %v1246_v50  ;;  %v2576_v55 = vmov (!%p4208_p1), 0.0  }
 0x3be   : > { %v1892_v56 = vsel %vm1891_vm10, %v1890_v25, %v1801_v22  ;;  %1388 = vst.msk [vmem:[%s3849_s8 + $0x50] sm:$0xff] %vm1377_vm12, %v1371_v52  ;;  %v1373_v24 = vmul.f32 %v4206_v37, %v1277_v7  ;;  %1393 = vst.msk [vmem:[%s3849_s8 + $0x78] sm:$0xff] %vm1377_vm12, %v1376_v59 }
 0x3bf   : > { %v1894_v61 = vsel %vm1893_vm13, %v1892_v56, %v1886_v16  ;;  %v1375_v57 = vmul.f32 %v4207_v3, %v1279_v14  ;;  %1901 = vst.msk [vmem:[#allocation7] sm:$0xff] (!%p4208_p1), %vm1377_vm12, %v2576_v55 }
 0x3c0   : > { %v1896_v35 = vsel %vm1895_vm0, %v1894_v61, 0.0  ;;  %1390 = vst.msk [vmem:[%s3849_s8 + $0x60] sm:$0xff] %vm1377_vm12, %v1373_v24 }
 0x3c1   : > { %1392 = vst.msk [vmem:[%s3849_s8 + $0x70] sm:$0xff] %vm1377_vm12, %v1375_v57 }
 0x3c2 PF: > { %1904 = vrot.lane.b32.xlu0 %v1896_v35, %s2575_s15  ;;  %s2577_s9 = smov [#allocation7]   ;;  %p2211_p4 = scmp.eq.s32.totalorder %s2617_s16, 1 }
 0x3c3   : > { %s1925_s11 = sshll.u32 %s2577_s9, 4  ;;  %s1926_s11 = int_to_ptr.vmem [resolvable:$true] %s1925_s11 }
 0x3c4   : > { %s2493_s12 = scalar_lea.vmem %s1926_s11, 128  ;;  %p2500_p10 = scmp.lt.s32.totalorder %s1926_s11, %s1926_s11 }
 0x3c5   : > { %p2494_p5 = scmp.ne.s32.totalorder %s1926_s11, %s2493_s12  ;;  %p2501_p12 = scmp.lt.s32.totalorder %s2493_s12, %s2493_s12 }
 0x3c6   : > { %v1902_v38 = vld [vmem:[#allocation7] sm:$0xff] }
 0x3c7   : > { %p2495_p6 = pnand %p2494_p5, %p2211_p4  ;;  %p2502_p0 = por %p2501_p12, %p2500_p10 }
 0x3c9   : > { %p2496_p9 = pneg %p2495_p6 }
 0x3cb   : > { %p2503_p2 = pnand %p2502_p0, %p2496_p9 }
 0x434   : > { %v1905_v5 = vpop.permute.xlu0 %1904 }
 0x435   : > { %v1907_v17 = vadd.f32 %v1905_v5, %v1902_v38 }
 0x437   : > { %1908 = vst.msk [vmem:[#allocation7] sm:$0xff] %vm1377_vm12, %v1907_v17 }
 0x438   : > { %2506 = shalt.err (!%p2503_p2)
}
 0x439   : > { %s2507_s26 = scalar_lea.hbm %s4090_s3, 128 }
 0x43a   : > { %p2508_p11 = scmp.ne.s32.totalorder %s4090_s3, %s2507_s26  ;;  %p2513_p8 = scmp.lt.u32.totalorder %s2507_s26, %s4090_s3 }
 0x43c   : > { %p2509_p13 = pnand %p2508_p11, %p2211_p4 }
 0x43e   : > { %p2510_p3 = pneg %p2509_p13 }
 0x440   : > { %p2515_p7 = pnand %p2513_p8, %p2510_p3 }
 0x442   : > { %2518 = shalt.err (!%p2515_p7)
}
 0x443   : > { %2197 = dma.vmem_to_hbm [thread:$0]  (%p2211_p4), %s1926_s11, 128, %s4090_s3, [#allocation4]  }
 0x444   : > { %2544 = dma.done.wait (%p2211_p4), [#allocation4], 128  }
 0x445   : > { %2546 = vsyncadd (%p2211_p4), [#allocation4], 4294967168 }
 0x446 PF: > { %p16_p1 = scmp.ge.s32.totalorder %s2643_s22, 4   ;;  %s4209_s12 = smov %s2553_s13 }
 0x447   : > { %s4210_s13 = smov %s2557_s14  ;;  %s4211_s14 = smov %s2672_s10 }
 0x448   : > { %s4212_s15 = smov %s2643_s22  ;;  %18 = sbr.rel (!%p16_p1) target bundleno = 5 (0x5), region = 85 }
 0x44f   :  { %1946 = vsyncpa [#allocation3], 1 }
 0x450   :  { %1948 = vsyncpa [#allocation3 + $0x1], 1 }
 0x451   :  { %1949 = vsyncpa [#allocation6], 1 }
 0x452   :  { %1950 = vsyncpa [#allocation4], 1 }
 0x453   :  { %1952 = vsyncpa [#allocation4 + $0x1], 1 }

</bundles_post_ra>
